<compile_context>
chip_gen: v5e
topology: v5e:2x2
jax: 0.10.0
libtpu: 0.0.40
codegen_flags: <defaults>
</compile_context>

<pallas_src>
import jax
import jax.numpy as jnp
from jax.experimental import pallas as pl
from jax.experimental.pallas import tpu as pltpu


# --------------------------------------------------------------------------
# Kernels
# --------------------------------------------------------------------------
def _conv3x3_rows_kernel(x_ref, top_ref, bot_ref, w_ref, b_ref, o_ref,
                         pad_ref, acc_ref):
    """3x3 / stride-1 / 'same' conv on one (batch, row-band) block.

    x_ref:   (1, TH, W, C)       input rows of this band
    top_ref: (1, 1, W, C)        row above the band (clamped copy at i == 0)
    bot_ref: (1, 1, W, C)        row below the band (clamped copy at last i)
    w_ref:   (9, C, Cout)  bf16  one (C, Cout) weight slab per tap
    b_ref:   (1, Cout)     f32   bias
    o_ref:   (1, TH*W, Cout)     output tokens of this band
    pad_ref: (TH+2, W+2, C) bf16 VMEM scratch: zero-padded band
    acc_ref: (TH*W, Cout)  f32   VMEM scratch: accumulator
    """
    i = pl.program_id(1)
    last = pl.num_programs(1) - 1
    _, TH, W, C = x_ref.shape
    cdt = pad_ref.dtype

    # ---- build the zero-padded band once in scratch (no concat copies) ----
    pad_ref[1:TH + 1, 1:W + 1, :] = x_ref[0].astype(cdt)
    pad_ref[0:1, 1:W + 1, :] = top_ref[0].astype(cdt)
    pad_ref[TH + 1:TH + 2, 1:W + 1, :] = bot_ref[0].astype(cdt)
    # zero the two padding columns (tiny: 2*(TH+2)*C elems); done every step so
    # correctness never depends on which core saw the "first" grid step.
    pad_ref[:, 0:1, :] = jnp.zeros((TH + 2, 1, C), cdt)
    pad_ref[:, W + 1:W + 2, :] = jnp.zeros((TH + 2, 1, C), cdt)

    # zero the halo rows at the image edges (the conv's zero padding) — cold paths.
    @pl.when(i == 0)
    def _():
        pad_ref[0:1, :, :] = jnp.zeros((1, W + 2, C), cdt)

    @pl.when(i == last)
    def _():
        pad_ref[TH + 1:TH + 2, :, :] = jnp.zeros((1, W + 2, C), cdt)

    # ---- nine tap matmuls accumulated in f32 (no materialized patch) ----
    M = TH * W
    for t in range(9):
        kh, kw = t // 3, t % 3
        tap = pad_ref[kh:kh + TH, kw:kw + W, :].reshape(M, C)
        contrib = jnp.dot(tap, w_ref[t], preferred_element_type=jnp.float32)
        if t == 0:
            acc_ref[...] = contrib
        else:
            acc_ref[...] += contrib

    o_ref[0] = (acc_ref[...] + b_ref[...]).astype(o_ref.dtype)


def _conv3x3_whole_kernel(x_ref, w_ref, b_ref, o_ref, pad_ref, acc_ref):
    """Whole-image 3x3 'same' conv on TB batch images per grid step.

    x_ref:   (TB, H, W, C)
    w_ref:   (9, C, Cout)  bf16
    b_ref:   (1, Cout)     f32
    o_ref:   (TB, H*W, Cout)
    pad_ref: (TB, H+2, W+2, C) bf16 scratch (per-image zero-padded)
    acc_ref: (TB*H*W, Cout) f32 scratch
    """
    TB, H, W, C = x_ref.shape
    Cout = w_ref.shape[2]
    cdt = pad_ref.dtype

    pad_ref[:, 1:H + 1, 1:W + 1, :] = x_ref[...].astype(cdt)
    # zero the one-pixel border of every image (all halos are zero here)
    pad_ref[:, 0:1, :, :] = jnp.zeros((TB, 1, W + 2, C), cdt)
    pad_ref[:, H + 1:H + 2, :, :] = jnp.zeros((TB, 1, W + 2, C), cdt)
    pad_ref[:, :, 0:1, :] = jnp.zeros((TB, H + 2, 1, C), cdt)
    pad_ref[:, :, W + 1:W + 2, :] = jnp.zeros((TB, H + 2, 1, C), cdt)

    M = TB * H * W
    for t in range(9):
        kh, kw = t // 3, t % 3
        tap = pad_ref[:, kh:kh + H, kw:kw + W, :].reshape(M, C)
        contrib = jnp.dot(tap, w_ref[t], preferred_element_type=jnp.float32)
        if t == 0:
            acc_ref[...] = contrib
        else:
            acc_ref[...] += contrib

    out = (acc_ref[...] + b_ref[...]).astype(o_ref.dtype)
    o_ref[...] = out.reshape(TB, H * W, Cout)


# --------------------------------------------------------------------------
# VMEM budgeting (generation-aware)
# --------------------------------------------------------------------------
def _vmem_budget():
    """(working-set budget, vmem_limit_bytes) derived from the chip's VMEM."""
    try:
        cap = int(pltpu.get_tpu_info().vmem_capacity_bytes)   # 64 MiB v7x, 128 MiB v5e/v6e
    except Exception:
        cap = 64 << 20                                        # conservative default
    working = max(cap // 3, 8 << 20)         # ~21 MiB on v7x, ~42 MiB on v5e/v6e
    limit = min((cap * 3) // 4, 96 << 20)    # 48 MiB on v7x, 96 MiB on v5e/v6e
    return working, int(limit)


def _rows_footprint(TH, W, C, Cout, x_bytes, o_bytes):
    bf16 = 2
    fp = 2 * TH * W * C * x_bytes            # input band, double-buffered
    fp += 2 * 2 * W * C * x_bytes            # top+bot halo rows, double-buffered
    fp += 2 * TH * W * Cout * o_bytes        # output block, double-buffered
    fp += (TH + 2) * (W + 2) * C * bf16      # padded-band scratch
    fp += TH * W * Cout * 4                  # f32 accumulator scratch
    fp += 2 * 9 * C * Cout * bf16            # weights (pipeline keeps 2 buffers)
    fp += TH * W * C * bf16 + TH * W * Cout * 4   # per-tap transients
    return fp


def _whole_footprint(TB, H, W, C, Cout, x_bytes, o_bytes):
    bf16 = 2
    fp = 2 * TB * H * W * C * x_bytes
    fp += 2 * TB * H * W * Cout * o_bytes
    fp += TB * (H + 2) * (W + 2) * C * bf16
    fp += TB * H * W * Cout * 4
    fp += 2 * 9 * C * Cout * bf16
    fp += TB * H * W * C * bf16 + TB * H * W * Cout * 4
    return fp


def _pick_row_tile(H, W, C, Cout, x_bytes, o_bytes, budget):
    """Largest row tile TH dividing H whose real per-step footprint fits budget."""
    feasible = []
    for t in range(H, 0, -1):
        if H % t:
            continue
        # output block second-minor dim must be a multiple of 8 (or the full HW)
        if (t * W) % 8 != 0 and t != H:
            continue
        feasible.append(t)
        if _rows_footprint(t, W, C, Cout, x_bytes, o_bytes) <= budget:
            return t
    return feasible[-1] if feasible else 1


# --------------------------------------------------------------------------
# Wrapper
# --------------------------------------------------------------------------
def tuna_conv2d(x, weight_hwio, bias, hw_shapes, row_tile=None, out_dtype=None):
    """Forward of swin_tuna Conv2d: (B, HW, C) tokens -> 3x3 'same' conv -> (B, HW, Cout).

    Note: MXU operands are rounded to bf16 (f32 accumulation) — ~1e-2 tolerance
    w.r.t. a strict f32 PyTorch conv.
    """
    B, HW, C = x.shape
    H, W = hw_shapes
    assert HW == H * W
    KH, KW, Cin, Cout = weight_hwio.shape
    assert (KH, KW) == (3, 3) and Cin == C   # TODO(synk): general k/stride/groups not implemented

    out_dtype = x.dtype if out_dtype is None else out_dtype
    x_bytes = jnp.dtype(x.dtype).itemsize
    o_bytes = jnp.dtype(out_dtype).itemsize
    working, vmem_limit = _vmem_budget()

    # Per-tap weight slabs (bf16) and f32 bias. x is fed in its own dtype and
    # cast to bf16 inside the kernel (no extra wrapper-side HBM cast pass).
    w_taps = weight_hwio.reshape(KH * KW, C, Cout).astype(jnp.bfloat16)
    b2d = bias.reshape(1, Cout).astype(jnp.float32)
    x_img = x.reshape(B, H, W, C)            # contiguous reshape, metadata only

    # ---- whole-image path: fold batch images into one grid step ----------
    if row_tile is None and _whole_footprint(1, H, W, C, Cout, x_bytes, o_bytes) <= working:
        TB = 1
        for cand in range(B, 0, -1):
            if B % cand:
                continue
            if cand * H * W > 4096:          # enough M to fill the MXU; no need for more
                continue
            if _whole_footprint(cand, H, W, C, Cout, x_bytes, o_bytes) <= working:
                TB = cand
                break
        return pl.pallas_call(
            _conv3x3_whole_kernel,
            out_shape=jax.ShapeDtypeStruct((B, HW, Cout), out_dtype),
            grid=(B // TB,),
            in_specs=[
                pl.BlockSpec((TB, H, W, C), lambda n: (n, 0, 0, 0)),
                pl.BlockSpec((KH * KW, C, Cout), lambda n: (0, 0, 0)),
                pl.BlockSpec((1, Cout), lambda n: (0, 0)),
            ],
            out_specs=pl.BlockSpec((TB, HW, Cout), lambda n: (n, 0, 0)),
            scratch_shapes=[
                pltpu.VMEM((TB, H + 2, W + 2, C), jnp.bfloat16),
                pltpu.VMEM((TB * HW, Cout), jnp.float32),
            ],
            compiler_params=pltpu.CompilerParams(
                dimension_semantics=("parallel",),
                vmem_limit_bytes=vmem_limit),
        )(x_img, w_taps, b2d)

    # ---- row-band path -----------------------------------------------------
    TH = row_tile if row_tile is not None else _pick_row_tile(
        H, W, C, Cout, x_bytes, o_bytes, working)
    assert H % TH == 0 and ((TH * W) % 8 == 0 or TH == H)
    n_tiles = H // TH   # grid = (B, n_tiles); both axes "parallel" for megacore

    return pl.pallas_call(
        _conv3x3_rows_kernel,
        out_shape=jax.ShapeDtypeStruct((B, HW, Cout), out_dtype),
        grid=(B, n_tiles),
        in_specs=[
            # main TH rows of the band
            pl.BlockSpec((1, TH, W, C), lambda b, i: (b, i, 0, 0)),
            # halo row above / below, clamped at the image edge (zeroed in-kernel)
            pl.BlockSpec((1, 1, W, C),
                         lambda b, i: (b, jnp.maximum(i * TH - 1, 0), 0, 0)),
            pl.BlockSpec((1, 1, W, C),
                         lambda b, i: (b, jnp.minimum((i + 1) * TH, H - 1), 0, 0)),
            # constant weight slabs and bias (same block every step)
            pl.BlockSpec((KH * KW, C, Cout), lambda b, i: (0, 0, 0)),
            pl.BlockSpec((1, Cout), lambda b, i: (0, 0)),
        ],
        # lane-dense token output written directly in (B, HW, Cout) layout
        out_specs=pl.BlockSpec((1, TH * W, Cout), lambda b, i: (b, i, 0)),
        scratch_shapes=[
            pltpu.VMEM((TH + 2, W + 2, C), jnp.bfloat16),
            pltpu.VMEM((TH * W, Cout), jnp.float32),
        ],
        compiler_params=pltpu.CompilerParams(
            dimension_semantics=("parallel", "parallel"),
            vmem_limit_bytes=vmem_limit),
    )(x_img, x_img, x_img, w_taps, b2d)


# --------------------------------------------------------------------------
# Params (c2_xavier_fill equivalent) and self-test
# --------------------------------------------------------------------------
def _init_params(key, cin, cout, kh, kw):
    """kaiming_uniform_(weight, a=1) -> U(-sqrt(3/fan_in), sqrt(3/fan_in)); bias = 0."""
    fan_in = cin * kh * kw
    bound = (3.0 / fan_in) ** 0.5
    w = jax.random.uniform(key, (kh, kw, cin, cout), jnp.float32,
                           minval=-bound, maxval=bound)   # HWIO
    b = jnp.zeros((cout,), jnp.float32)
    return w, b


if __name__ == "__main__":
    key = jax.random.PRNGKey(0)
    kx, kw_key = jax.random.split(key)

    B, C, H, W = 2, 4, 16, 16
    HW = H * W

    x = jax.random.normal(kx, (B, HW, C), jnp.float32)      # (b, hw, c) tokens
    weight, bias = _init_params(kw_key, C, C, 3, 3)

    # Exercise both paths: the row-band (halo) kernel and the batched
    # whole-image kernel picked automatically for this small feature map.
    out_rows = jax.block_until_ready(tuna_conv2d(x, weight, bias, (H, W), row_tile=4))
    out_auto = jax.block_until_ready(tuna_conv2d(x, weight, bias, (H, W)))

    # Reference: identical bf16-operand / f32-accumulate conv via lax (NCHW/OIHW),
    # i.e. the PyTorch conv with the same operand rounding as the kernel.
    x_nchw = x.reshape(B, H, W, C).astype(jnp.bfloat16).transpose(0, 3, 1, 2)
    w_oihw = weight.astype(jnp.bfloat16).transpose(3, 2, 0, 1)
    ref = jax.lax.conv_general_dilated(
        x_nchw, w_oihw, window_strides=(1, 1), padding=((1, 1), (1, 1)),
        dimension_numbers=("NCHW", "OIHW", "NCHW"),
        preferred_element_type=jnp.float32)
    ref = ref + bias[None, :, None, None]
    ref_tokens = ref.reshape(B, C, HW).transpose(0, 2, 1)    # back to (b, hw, c)

    assert out_rows.shape == (B, HW, C) and out_auto.shape == (B, HW, C)
    assert jnp.max(jnp.abs(out_rows - ref_tokens)) < 1e-2
    assert jnp.max(jnp.abs(out_auto - ref_tokens)) < 1e-2
    print("KERNEL_OK")
</pallas_src>

<mosaic_0001>
module attributes {stable_mosaic.version = 11 : i64} {
  func.func @_conv3x3_rows_kernel(%arg0: i32, %arg1: i32, %arg2: memref<1x4x16x4xf32, #tpu.memory_space<vmem>>, %arg3: memref<1x1x16x4xf32, #tpu.memory_space<vmem>>, %arg4: memref<1x1x16x4xf32, #tpu.memory_space<vmem>>, %arg5: memref<9x4x4xbf16, #tpu.memory_space<vmem>>, %arg6: memref<1x4xf32, #tpu.memory_space<vmem>>, %arg7: memref<1x64x4xf32, #tpu.memory_space<vmem>>, %arg8: memref<6x18x4xbf16, #tpu.memory_space<vmem>>, %arg9: memref<64x4xf32, #tpu.memory_space<vmem>>) attributes {dimension_semantics = [#tpu.dimension_semantics<parallel>, #tpu.dimension_semantics<parallel>], iteration_bounds = array<i64: 2, 4>, scalar_prefetch = 0 : i64, scratch_operands = 2 : i64, tpu.core_type = #tpu.core_type<tc>, window_params = [{transform_indices = @transform_0, window_bounds = array<i64: 1, 4, 16, 4>}, {transform_indices = @transform_1, window_bounds = array<i64: 1, 1, 16, 4>}, {transform_indices = @transform_2, window_bounds = array<i64: 1, 1, 16, 4>}, {pipeline_mode = #tpu.pipeline_mode<synchronous>, transform_indices = @transform_3, window_bounds = array<i64: 9, 4, 4>}, {pipeline_mode = #tpu.pipeline_mode<synchronous>, transform_indices = @transform_4, window_bounds = array<i64: 1, 4>}, {transform_indices = @transform_5, window_bounds = array<i64: 1, 64, 4>}]} {
    %c0 = arith.constant 0 : index
    %c0_0 = arith.constant 0 : index
    %c0_1 = arith.constant 0 : index
    %c0_2 = arith.constant 0 : index
    %0 = vector.load %arg2[%c0, %c0_0, %c0_1, %c0_2] : memref<1x4x16x4xf32, #tpu.memory_space<vmem>>, vector<1x4x16x4xf32>
    %1 = vector.shape_cast %0 : vector<1x4x16x4xf32> to vector<4x16x4xf32>
    %2 = arith.truncf %1 : vector<4x16x4xf32> to vector<4x16x4xbf16>
    %c1 = arith.constant 1 : index
    %c1_3 = arith.constant 1 : index
    %c0_4 = arith.constant 0 : index
    %3 = vector.load %arg8[%c1, %c1_3, %c0_4] : memref<6x18x4xbf16, #tpu.memory_space<vmem>>, vector<4x16x4xbf16>
    tpu.vector_store %arg8[%c1, %c1_3, %c0_4], %2 {strides = array<i32>} : memref<6x18x4xbf16, #tpu.memory_space<vmem>>, vector<4x16x4xbf16>,
    %c0_5 = arith.constant 0 : index
    %c0_6 = arith.constant 0 : index
    %c0_7 = arith.constant 0 : index
    %c0_8 = arith.constant 0 : index
    %4 = vector.load %arg3[%c0_5, %c0_6, %c0_7, %c0_8] : memref<1x1x16x4xf32, #tpu.memory_space<vmem>>, vector<1x1x16x4xf32>
    %5 = vector.shape_cast %4 : vector<1x1x16x4xf32> to vector<1x16x4xf32>
    %6 = arith.truncf %5 : vector<1x16x4xf32> to vector<1x16x4xbf16>
    %c0_9 = arith.constant 0 : index
    %c1_10 = arith.constant 1 : index
    %c0_11 = arith.constant 0 : index
    %7 = vector.load %arg8[%c0_9, %c1_10, %c0_11] : memref<6x18x4xbf16, #tpu.memory_space<vmem>>, vector<1x16x4xbf16>
    tpu.vector_store %arg8[%c0_9, %c1_10, %c0_11], %6 {strides = array<i32>} : memref<6x18x4xbf16, #tpu.memory_space<vmem>>, vector<1x16x4xbf16>,
    %c0_12 = arith.constant 0 : index
    %c0_13 = arith.constant 0 : index
    %c0_14 = arith.constant 0 : index
    %c0_15 = arith.constant 0 : index
    %8 = vector.load %arg4[%c0_12, %c0_13, %c0_14, %c0_15] : memref<1x1x16x4xf32, #tpu.memory_space<vmem>>, vector<1x1x16x4xf32>
    %9 = vector.shape_cast %8 : vector<1x1x16x4xf32> to vector<1x16x4xf32>
    %10 = arith.truncf %9 : vector<1x16x4xf32> to vector<1x16x4xbf16>
    %c5 = arith.constant 5 : index
    %c1_16 = arith.constant 1 : index
    %c0_17 = arith.constant 0 : index
    %11 = vector.load %arg8[%c5, %c1_16, %c0_17] : memref<6x18x4xbf16, #tpu.memory_space<vmem>>, vector<1x16x4xbf16>
    tpu.vector_store %arg8[%c5, %c1_16, %c0_17], %10 {strides = array<i32>} : memref<6x18x4xbf16, #tpu.memory_space<vmem>>, vector<1x16x4xbf16>,
    %cst = arith.constant 0.000000e+00 : bf16
    %12 = vector.broadcast %cst : bf16 to vector<6x1x4xbf16>
    %c0_18 = arith.constant 0 : index
    %c0_19 = arith.constant 0 : index
    %c0_20 = arith.constant 0 : index
    %13 = vector.load %arg8[%c0_18, %c0_19, %c0_20] : memref<6x18x4xbf16, #tpu.memory_space<vmem>>, vector<6x1x4xbf16>
    tpu.vector_store %arg8[%c0_18, %c0_19, %c0_20], %12 {strides = array<i32>} : memref<6x18x4xbf16, #tpu.memory_space<vmem>>, vector<6x1x4xbf16>,
    %cst_21 = arith.constant 0.000000e+00 : bf16
    %14 = vector.broadcast %cst_21 : bf16 to vector<6x1x4xbf16>
    %c0_22 = arith.constant 0 : index
    %c17 = arith.constant 17 : index
    %c0_23 = arith.constant 0 : index
    %15 = vector.load %arg8[%c0_22, %c17, %c0_23] : memref<6x18x4xbf16, #tpu.memory_space<vmem>>, vector<6x1x4xbf16>
    tpu.vector_store %arg8[%c0_22, %c17, %c0_23], %14 {strides = array<i32>} : memref<6x18x4xbf16, #tpu.memory_space<vmem>>, vector<6x1x4xbf16>,
    %c0_i32 = arith.constant 0 : i32
    %16 = arith.cmpi eq, %arg1, %c0_i32 : i32
    %17 = arith.extui %16 : i1 to i32
    %c0_i32_24 = arith.constant 0 : i32
    %18 = arith.cmpi ne, %17, %c0_i32_24 : i32
    scf.if %18 {
      %cst_124 = arith.constant 0.000000e+00 : bf16
      %99 = vector.broadcast %cst_124 : bf16 to vector<1x18x4xbf16>
      %c0_125 = arith.constant 0 : index
      %c0_126 = arith.constant 0 : index
      %c0_127 = arith.constant 0 : index
      %100 = vector.load %arg8[%c0_125, %c0_126, %c0_127] : memref<6x18x4xbf16, #tpu.memory_space<vmem>>, vector<1x18x4xbf16>
      tpu.vector_store %arg8[%c0_125, %c0_126, %c0_127], %99 {strides = array<i32>} : memref<6x18x4xbf16, #tpu.memory_space<vmem>>, vector<1x18x4xbf16>,
    } else {
    }
    %c3_i32 = arith.constant 3 : i32
    %19 = arith.cmpi eq, %arg1, %c3_i32 : i32
    %20 = arith.extui %19 : i1 to i32
    %c0_i32_25 = arith.constant 0 : i32
    %21 = arith.cmpi ne, %20, %c0_i32_25 : i32
    scf.if %21 {
      %cst_124 = arith.constant 0.000000e+00 : bf16
      %99 = vector.broadcast %cst_124 : bf16 to vector<1x18x4xbf16>
      %c5_125 = arith.constant 5 : index
      %c0_126 = arith.constant 0 : index
      %c0_127 = arith.constant 0 : index
      %100 = vector.load %arg8[%c5_125, %c0_126, %c0_127] : memref<6x18x4xbf16, #tpu.memory_space<vmem>>, vector<1x18x4xbf16>
      tpu.vector_store %arg8[%c5_125, %c0_126, %c0_127], %99 {strides = array<i32>} : memref<6x18x4xbf16, #tpu.memory_space<vmem>>, vector<1x18x4xbf16>,
    } else {
    }
    %c0_26 = arith.constant 0 : index
    %c0_27 = arith.constant 0 : index
    %c0_28 = arith.constant 0 : index
    %22 = vector.load %arg8[%c0_26, %c0_27, %c0_28] : memref<6x18x4xbf16, #tpu.memory_space<vmem>>, vector<4x16x4xbf16>
    %23 = vector.shape_cast %22 : vector<4x16x4xbf16> to vector<64x4xbf16>
    %c0_29 = arith.constant 0 : index
    %c0_30 = arith.constant 0 : index
    %c0_31 = arith.constant 0 : index
    %24 = vector.load %arg5[%c0_29, %c0_30, %c0_31] : memref<9x4x4xbf16, #tpu.memory_space<vmem>>, vector<1x4x4xbf16>
    %25 = vector.shape_cast %24 : vector<1x4x4xbf16> to vector<4x4xbf16>
    %cst_32 = arith.constant dense<0.000000e+00> : vector<64x4xf32>
    %26 = tpu.matmul %23, %25, %cst_32 {dimension_numbers = #tpu.dot_dimension_numbers<[1], [0], [0], [1], [0, 0, 1, 1], [], []>} : vector<64x4xbf16>, vector<4x4xbf16>, vector<64x4xf32> -> vector<64x4xf32>
    %c0_33 = arith.constant 0 : index
    %c0_34 = arith.constant 0 : index
    %27 = vector.load %arg9[%c0_33, %c0_34] : memref<64x4xf32, #tpu.memory_space<vmem>>, vector<64x4xf32>
    tpu.vector_store %arg9[%c0_33, %c0_34], %26 {strides = array<i32>} : memref<64x4xf32, #tpu.memory_space<vmem>>, vector<64x4xf32>,
    %c0_35 = arith.constant 0 : index
    %c1_36 = arith.constant 1 : index
    %c0_37 = arith.constant 0 : index
    %28 = vector.load %arg8[%c0_35, %c1_36, %c0_37] : memref<6x18x4xbf16, #tpu.memory_space<vmem>>, vector<4x16x4xbf16>
    %29 = vector.shape_cast %28 : vector<4x16x4xbf16> to vector<64x4xbf16>
    %c1_38 = arith.constant 1 : index
    %c0_39 = arith.constant 0 : index
    %c0_40 = arith.constant 0 : index
    %30 = vector.load %arg5[%c1_38, %c0_39, %c0_40] : memref<9x4x4xbf16, #tpu.memory_space<vmem>>, vector<1x4x4xbf16>
    %31 = vector.shape_cast %30 : vector<1x4x4xbf16> to vector<4x4xbf16>
    %cst_41 = arith.constant dense<0.000000e+00> : vector<64x4xf32>
    %32 = tpu.matmul %29, %31, %cst_41 {dimension_numbers = #tpu.dot_dimension_numbers<[1], [0], [0], [1], [0, 0, 1, 1], [], []>} : vector<64x4xbf16>, vector<4x4xbf16>, vector<64x4xf32> -> vector<64x4xf32>
    %c0_42 = arith.constant 0 : index
    %c0_43 = arith.constant 0 : index
    %33 = vector.load %arg9[%c0_42, %c0_43] : memref<64x4xf32, #tpu.memory_space<vmem>>, vector<64x4xf32>
    %34 = arith.addf %33, %32 : vector<64x4xf32>
    %c0_44 = arith.constant 0 : index
    %c0_45 = arith.constant 0 : index
    %35 = vector.load %arg9[%c0_44, %c0_45] : memref<64x4xf32, #tpu.memory_space<vmem>>, vector<64x4xf32>
    tpu.vector_store %arg9[%c0_44, %c0_45], %34 {strides = array<i32>} : memref<64x4xf32, #tpu.memory_space<vmem>>, vector<64x4xf32>,
    %c0_46 = arith.constant 0 : index
    %c2 = arith.constant 2 : index
    %c0_47 = arith.constant 0 : index
    %36 = vector.load %arg8[%c0_46, %c2, %c0_47] : memref<6x18x4xbf16, #tpu.memory_space<vmem>>, vector<4x16x4xbf16>
    %37 = vector.shape_cast %36 : vector<4x16x4xbf16> to vector<64x4xbf16>
    %c2_48 = arith.constant 2 : index
    %c0_49 = arith.constant 0 : index
    %c0_50 = arith.constant 0 : index
    %38 = vector.load %arg5[%c2_48, %c0_49, %c0_50] : memref<9x4x4xbf16, #tpu.memory_space<vmem>>, vector<1x4x4xbf16>
    %39 = vector.shape_cast %38 : vector<1x4x4xbf16> to vector<4x4xbf16>
    %cst_51 = arith.constant dense<0.000000e+00> : vector<64x4xf32>
    %40 = tpu.matmul %37, %39, %cst_51 {dimension_numbers = #tpu.dot_dimension_numbers<[1], [0], [0], [1], [0, 0, 1, 1], [], []>} : vector<64x4xbf16>, vector<4x4xbf16>, vector<64x4xf32> -> vector<64x4xf32>
    %c0_52 = arith.constant 0 : index
    %c0_53 = arith.constant 0 : index
    %41 = vector.load %arg9[%c0_52, %c0_53] : memref<64x4xf32, #tpu.memory_space<vmem>>, vector<64x4xf32>
    %42 = arith.addf %41, %40 : vector<64x4xf32>
    %c0_54 = arith.constant 0 : index
    %c0_55 = arith.constant 0 : index
    %43 = vector.load %arg9[%c0_54, %c0_55] : memref<64x4xf32, #tpu.memory_space<vmem>>, vector<64x4xf32>
    tpu.vector_store %arg9[%c0_54, %c0_55], %42 {strides = array<i32>} : memref<64x4xf32, #tpu.memory_space<vmem>>, vector<64x4xf32>,
    %c1_56 = arith.constant 1 : index
    %c0_57 = arith.constant 0 : index
    %c0_58 = arith.constant 0 : index
    %44 = vector.load %arg8[%c1_56, %c0_57, %c0_58] : memref<6x18x4xbf16, #tpu.memory_space<vmem>>, vector<4x16x4xbf16>
    %45 = vector.shape_cast %44 : vector<4x16x4xbf16> to vector<64x4xbf16>
    %c3 = arith.constant 3 : index
    %c0_59 = arith.constant 0 : index
    %c0_60 = arith.constant 0 : index
    %46 = vector.load %arg5[%c3, %c0_59, %c0_60] : memref<9x4x4xbf16, #tpu.memory_space<vmem>>, vector<1x4x4xbf16>
    %47 = vector.shape_cast %46 : vector<1x4x4xbf16> to vector<4x4xbf16>
    %cst_61 = arith.constant dense<0.000000e+00> : vector<64x4xf32>
    %48 = tpu.matmul %45, %47, %cst_61 {dimension_numbers = #tpu.dot_dimension_numbers<[1], [0], [0], [1], [0, 0, 1, 1], [], []>} : vector<64x4xbf16>, vector<4x4xbf16>, vector<64x4xf32> -> vector<64x4xf32>
    %c0_62 = arith.constant 0 : index
    %c0_63 = arith.constant 0 : index
    %49 = vector.load %arg9[%c0_62, %c0_63] : memref<64x4xf32, #tpu.memory_space<vmem>>, vector<64x4xf32>
    %50 = arith.addf %49, %48 : vector<64x4xf32>
    %c0_64 = arith.constant 0 : index
    %c0_65 = arith.constant 0 : index
    %51 = vector.load %arg9[%c0_64, %c0_65] : memref<64x4xf32, #tpu.memory_space<vmem>>, vector<64x4xf32>
    tpu.vector_store %arg9[%c0_64, %c0_65], %50 {strides = array<i32>} : memref<64x4xf32, #tpu.memory_space<vmem>>, vector<64x4xf32>,
    %c1_66 = arith.constant 1 : index
    %c1_67 = arith.constant 1 : index
    %c0_68 = arith.constant 0 : index
    %52 = vector.load %arg8[%c1_66, %c1_67, %c0_68] : memref<6x18x4xbf16, #tpu.memory_space<vmem>>, vector<4x16x4xbf16>
    %53 = vector.shape_cast %52 : vector<4x16x4xbf16> to vector<64x4xbf16>
    %c4 = arith.constant 4 : index
    %c0_69 = arith.constant 0 : index
    %c0_70 = arith.constant 0 : index
    %54 = vector.load %arg5[%c4, %c0_69, %c0_70] : memref<9x4x4xbf16, #tpu.memory_space<vmem>>, vector<1x4x4xbf16>
    %55 = vector.shape_cast %54 : vector<1x4x4xbf16> to vector<4x4xbf16>
    %cst_71 = arith.constant dense<0.000000e+00> : vector<64x4xf32>
    %56 = tpu.matmul %53, %55, %cst_71 {dimension_numbers = #tpu.dot_dimension_numbers<[1], [0], [0], [1], [0, 0, 1, 1], [], []>} : vector<64x4xbf16>, vector<4x4xbf16>, vector<64x4xf32> -> vector<64x4xf32>
    %c0_72 = arith.constant 0 : index
    %c0_73 = arith.constant 0 : index
    %57 = vector.load %arg9[%c0_72, %c0_73] : memref<64x4xf32, #tpu.memory_space<vmem>>, vector<64x4xf32>
    %58 = arith.addf %57, %56 : vector<64x4xf32>
    %c0_74 = arith.constant 0 : index
    %c0_75 = arith.constant 0 : index
    %59 = vector.load %arg9[%c0_74, %c0_75] : memref<64x4xf32, #tpu.memory_space<vmem>>, vector<64x4xf32>
    tpu.vector_store %arg9[%c0_74, %c0_75], %58 {strides = array<i32>} : memref<64x4xf32, #tpu.memory_space<vmem>>, vector<64x4xf32>,
    %c1_76 = arith.constant 1 : index
    %c2_77 = arith.constant 2 : index
    %c0_78 = arith.constant 0 : index
    %60 = vector.load %arg8[%c1_76, %c2_77, %c0_78] : memref<6x18x4xbf16, #tpu.memory_space<vmem>>, vector<4x16x4xbf16>
    %61 = vector.shape_cast %60 : vector<4x16x4xbf16> to vector<64x4xbf16>
    %c5_79 = arith.constant 5 : index
    %c0_80 = arith.constant 0 : index
    %c0_81 = arith.constant 0 : index
    %62 = vector.load %arg5[%c5_79, %c0_80, %c0_81] : memref<9x4x4xbf16, #tpu.memory_space<vmem>>, vector<1x4x4xbf16>
    %63 = vector.shape_cast %62 : vector<1x4x4xbf16> to vector<4x4xbf16>
    %cst_82 = arith.constant dense<0.000000e+00> : vector<64x4xf32>
    %64 = tpu.matmul %61, %63, %cst_82 {dimension_numbers = #tpu.dot_dimension_numbers<[1], [0], [0], [1], [0, 0, 1, 1], [], []>} : vector<64x4xbf16>, vector<4x4xbf16>, vector<64x4xf32> -> vector<64x4xf32>
    %c0_83 = arith.constant 0 : index
    %c0_84 = arith.constant 0 : index
    %65 = vector.load %arg9[%c0_83, %c0_84] : memref<64x4xf32, #tpu.memory_space<vmem>>, vector<64x4xf32>
    %66 = arith.addf %65, %64 : vector<64x4xf32>
    %c0_85 = arith.constant 0 : index
    %c0_86 = arith.constant 0 : index
    %67 = vector.load %arg9[%c0_85, %c0_86] : memref<64x4xf32, #tpu.memory_space<vmem>>, vector<64x4xf32>
    tpu.vector_store %arg9[%c0_85, %c0_86], %66 {strides = array<i32>} : memref<64x4xf32, #tpu.memory_space<vmem>>, vector<64x4xf32>,
    %c2_87 = arith.constant 2 : index
    %c0_88 = arith.constant 0 : index
    %c0_89 = arith.constant 0 : index
    %68 = vector.load %arg8[%c2_87, %c0_88, %c0_89] : memref<6x18x4xbf16, #tpu.memory_space<vmem>>, vector<4x16x4xbf16>
    %69 = vector.shape_cast %68 : vector<4x16x4xbf16> to vector<64x4xbf16>
    %c6 = arith.constant 6 : index
    %c0_90 = arith.constant 0 : index
    %c0_91 = arith.constant 0 : index
    %70 = vector.load %arg5[%c6, %c0_90, %c0_91] : memref<9x4x4xbf16, #tpu.memory_space<vmem>>, vector<1x4x4xbf16>
    %71 = vector.shape_cast %70 : vector<1x4x4xbf16> to vector<4x4xbf16>
    %cst_92 = arith.constant dense<0.000000e+00> : vector<64x4xf32>
    %72 = tpu.matmul %69, %71, %cst_92 {dimension_numbers = #tpu.dot_dimension_numbers<[1], [0], [0], [1], [0, 0, 1, 1], [], []>} : vector<64x4xbf16>, vector<4x4xbf16>, vector<64x4xf32> -> vector<64x4xf32>
    %c0_93 = arith.constant 0 : index
    %c0_94 = arith.constant 0 : index
    %73 = vector.load %arg9[%c0_93, %c0_94] : memref<64x4xf32, #tpu.memory_space<vmem>>, vector<64x4xf32>
    %74 = arith.addf %73, %72 : vector<64x4xf32>
    %c0_95 = arith.constant 0 : index
    %c0_96 = arith.constant 0 : index
    %75 = vector.load %arg9[%c0_95, %c0_96] : memref<64x4xf32, #tpu.memory_space<vmem>>, vector<64x4xf32>
    tpu.vector_store %arg9[%c0_95, %c0_96], %74 {strides = array<i32>} : memref<64x4xf32, #tpu.memory_space<vmem>>, vector<64x4xf32>,
    %c2_97 = arith.constant 2 : index
    %c1_98 = arith.constant 1 : index
    %c0_99 = arith.constant 0 : index
    %76 = vector.load %arg8[%c2_97, %c1_98, %c0_99] : memref<6x18x4xbf16, #tpu.memory_space<vmem>>, vector<4x16x4xbf16>
    %77 = vector.shape_cast %76 : vector<4x16x4xbf16> to vector<64x4xbf16>
    %c7 = arith.constant 7 : index
    %c0_100 = arith.constant 0 : index
    %c0_101 = arith.constant 0 : index
    %78 = vector.load %arg5[%c7, %c0_100, %c0_101] : memref<9x4x4xbf16, #tpu.memory_space<vmem>>, vector<1x4x4xbf16>
    %79 = vector.shape_cast %78 : vector<1x4x4xbf16> to vector<4x4xbf16>
    %cst_102 = arith.constant dense<0.000000e+00> : vector<64x4xf32>
    %80 = tpu.matmul %77, %79, %cst_102 {dimension_numbers = #tpu.dot_dimension_numbers<[1], [0], [0], [1], [0, 0, 1, 1], [], []>} : vector<64x4xbf16>, vector<4x4xbf16>, vector<64x4xf32> -> vector<64x4xf32>
    %c0_103 = arith.constant 0 : index
    %c0_104 = arith.constant 0 : index
    %81 = vector.load %arg9[%c0_103, %c0_104] : memref<64x4xf32, #tpu.memory_space<vmem>>, vector<64x4xf32>
    %82 = arith.addf %81, %80 : vector<64x4xf32>
    %c0_105 = arith.constant 0 : index
    %c0_106 = arith.constant 0 : index
    %83 = vector.load %arg9[%c0_105, %c0_106] : memref<64x4xf32, #tpu.memory_space<vmem>>, vector<64x4xf32>
    tpu.vector_store %arg9[%c0_105, %c0_106], %82 {strides = array<i32>} : memref<64x4xf32, #tpu.memory_space<vmem>>, vector<64x4xf32>,
    %c2_107 = arith.constant 2 : index
    %c2_108 = arith.constant 2 : index
    %c0_109 = arith.constant 0 : index
    %84 = vector.load %arg8[%c2_107, %c2_108, %c0_109] : memref<6x18x4xbf16, #tpu.memory_space<vmem>>, vector<4x16x4xbf16>
    %85 = vector.shape_cast %84 : vector<4x16x4xbf16> to vector<64x4xbf16>
    %c8 = arith.constant 8 : index
    %c0_110 = arith.constant 0 : index
    %c0_111 = arith.constant 0 : index
    %86 = vector.load %arg5[%c8, %c0_110, %c0_111] : memref<9x4x4xbf16, #tpu.memory_space<vmem>>, vector<1x4x4xbf16>
    %87 = vector.shape_cast %86 : vector<1x4x4xbf16> to vector<4x4xbf16>
    %cst_112 = arith.constant dense<0.000000e+00> : vector<64x4xf32>
    %88 = tpu.matmul %85, %87, %cst_112 {dimension_numbers = #tpu.dot_dimension_numbers<[1], [0], [0], [1], [0, 0, 1, 1], [], []>} : vector<64x4xbf16>, vector<4x4xbf16>, vector<64x4xf32> -> vector<64x4xf32>
    %c0_113 = arith.constant 0 : index
    %c0_114 = arith.constant 0 : index
    %89 = vector.load %arg9[%c0_113, %c0_114] : memref<64x4xf32, #tpu.memory_space<vmem>>, vector<64x4xf32>
    %90 = arith.addf %89, %88 : vector<64x4xf32>
    %c0_115 = arith.constant 0 : index
    %c0_116 = arith.constant 0 : index
    %91 = vector.load %arg9[%c0_115, %c0_116] : memref<64x4xf32, #tpu.memory_space<vmem>>, vector<64x4xf32>
    tpu.vector_store %arg9[%c0_115, %c0_116], %90 {strides = array<i32>} : memref<64x4xf32, #tpu.memory_space<vmem>>, vector<64x4xf32>,
    %c0_117 = arith.constant 0 : index
    %c0_118 = arith.constant 0 : index
    %92 = vector.load %arg9[%c0_117, %c0_118] : memref<64x4xf32, #tpu.memory_space<vmem>>, vector<64x4xf32>
    %c0_119 = arith.constant 0 : index
    %c0_120 = arith.constant 0 : index
    %93 = vector.load %arg6[%c0_119, %c0_120] : memref<1x4xf32, #tpu.memory_space<vmem>>, vector<1x4xf32>
    %94 = vector.broadcast %93 : vector<1x4xf32> to vector<64x4xf32>
    %95 = arith.addf %92, %94 : vector<64x4xf32>
    %c0_121 = arith.constant 0 : index
    %c0_122 = arith.constant 0 : index
    %c0_123 = arith.constant 0 : index
    %96 = vector.load %arg7[%c0_121, %c0_122, %c0_123] : memref<1x64x4xf32, #tpu.memory_space<vmem>>, vector<1x64x4xf32>
    %97 = vector.shape_cast %96 : vector<1x64x4xf32> to vector<64x4xf32>
    %98 = vector.shape_cast %95 : vector<64x4xf32> to vector<1x64x4xf32>
    tpu.vector_store %arg7[%c0_121, %c0_122, %c0_123], %98 {strides = array<i32>} : memref<1x64x4xf32, #tpu.memory_space<vmem>>, vector<1x64x4xf32>,
    return
  }
  func.func @transform_0(%arg0: i32, %arg1: i32) -> (i32, i32, i32, i32) {
    %c0_i32 = arith.constant 0 : i32
    %c0_i32_0 = arith.constant 0 : i32
    %c0_i32_1 = arith.constant 0 : i32
    return %arg0, %arg1, %c0_i32, %c0_i32_0 : i32, i32, i32, i32
  }
  func.func @transform_1(%arg0: i32, %arg1: i32) -> (i32, i32, i32, i32) {
    %c4_i32 = arith.constant 4 : i32
    %0 = arith.muli %arg1, %c4_i32 : i32
    %c1_i32 = arith.constant 1 : i32
    %1 = arith.subi %0, %c1_i32 : i32
    %c0_i32 = arith.constant 0 : i32
    %2 = arith.maxsi %1, %c0_i32 : i32
    %c0_i32_0 = arith.constant 0 : i32
    %c0_i32_1 = arith.constant 0 : i32
    %c0_i32_2 = arith.constant 0 : i32
    return %arg0, %2, %c0_i32_0, %c0_i32_1 : i32, i32, i32, i32
  }
  func.func @transform_2(%arg0: i32, %arg1: i32) -> (i32, i32, i32, i32) {
    %c1_i32 = arith.constant 1 : i32
    %0 = arith.addi %arg1, %c1_i32 : i32
    %c4_i32 = arith.constant 4 : i32
    %1 = arith.muli %0, %c4_i32 : i32
    %c15_i32 = arith.constant 15 : i32
    %2 = arith.minsi %1, %c15_i32 : i32
    %c0_i32 = arith.constant 0 : i32
    %c0_i32_0 = arith.constant 0 : i32
    %c0_i32_1 = arith.constant 0 : i32
    return %arg0, %2, %c0_i32, %c0_i32_0 : i32, i32, i32, i32
  }
  func.func @transform_3(%arg0: i32, %arg1: i32) -> (i32, i32, i32) {
    %c0_i32 = arith.constant 0 : i32
    %c0_i32_0 = arith.constant 0 : i32
    %c0_i32_1 = arith.constant 0 : i32
    %c0_i32_2 = arith.constant 0 : i32
    return %c0_i32, %c0_i32_0, %c0_i32_1 : i32, i32, i32
  }
  func.func @transform_4(%arg0: i32, %arg1: i32) -> (i32, i32) {
    %c0_i32 = arith.constant 0 : i32
    %c0_i32_0 = arith.constant 0 : i32
    %c0_i32_1 = arith.constant 0 : i32
    return %c0_i32, %c0_i32_0 : i32, i32
  }
  func.func @transform_5(%arg0: i32, %arg1: i32) -> (i32, i32, i32) {
    %c0_i32 = arith.constant 0 : i32
    %c0_i32_0 = arith.constant 0 : i32
    return %arg0, %arg1, %c0_i32 : i32, i32, i32
  }
}

</mosaic_0001>

<bundles_post_ra>
// kernel: tpu_custom_call.1
= control target key start
LH: loop header
LB: loop body
LE: loop exit
PB: predicated region body
PF: predicated region fallthrough
CT: control target
= control target key end

     0   :  { %s2344_s18 = smov 0   ;;  %s2346_s19 = smov 0   ;;  %s2862_s0 = inlined_call_operand.vmem [shape: f32[2,16,16,4], index: 0, kind: input, shape index: {}]   ;;  %s2863_s1 = inlined_call_operand.vmem [shape: f32[2,16,16,4], index: 1, kind: input, shape index: {}]   ;;  %s2864_s2 = inlined_call_operand.vmem [shape: f32[2,16,16,4], index: 2, kind: input, shape index: {}]   ;;  %s2865_s3 = inlined_call_operand.vmem [shape: bf16[9,4,4], index: 3, kind: input, shape index: {}]   ;;  %s2866_s4 = inlined_call_operand.vmem [shape: f32[1,4], index: 4, kind: input, shape index: {}]   ;;  %s2867_s5 = inlined_call_operand.vmem [shape: f32[2,256,4], index: 5, kind: output, shape index: {}]  }
   0x1   :  { %s2348_s20 = smov 0   ;;  %s2350_s21 = smov 0  }
   0x2   :  { %s2352_s22 = smov 0  }
   0x3 LB: > { %s24_s23 = sadd.s32 1, %s2302_s20  ;;  %s27_s24 = sadd.s32 1, %s2306_s21  ;;  %s2310_s22 = sphi %s2352_s22, %s15_s22   ;;  %s2306_s21 = sphi %s2350_s21, %s2884_s21   ;;  %s2302_s20 = sphi %s2348_s20, %s2883_s20   ;;  %s2298_s19 = sphi %s2346_s19, %s2882_s19   ;;  %s2294_s18 = sphi %s2344_s18, %s2881_s18  }
   0x4   : > { %p25_p0 = scmp.ge.s32.totalorder %s24_s23, 4  ;;  %p2073_p1 = scmp.ge.s32.totalorder %s2310_s22, 1 }
   0x5   : > { %p273_p2 = scmp.lt.s32.totalorder %s2310_s22, 9 }
   0x6   : > { %s2886_s23 = smov (%p25_p0, %s24_s23), 0  ;;  %s2888_s24 = smov (!%p25_p0, %s27_s24), %s2306_s21 }
   0x7   : > { %p274_p3 = pnand %p2073_p1, %p273_p2  ;;  %p29_p4 = scmp.ge.s32.totalorder %s2888_s24, 2 }
   0x8   : > { %s2377_s25 = sshll.u32 (!%p274_p3), %s2294_s18, 2  ;;  %p337_p5 = scmp.lt.s32.totalorder (!%p274_p3), %s2298_s19, 1 }
   0x9   : > { %s2890_s24 = smov (%p29_p4, %s2888_s24), 0  ;;  %277 = sbr.rel (%p274_p3) target bundleno = 387 (0x183), region = 40 }
   0xa   : > { %p339_p6 = scmp.lt.s32.totalorder (!%p274_p3), %s2377_s25, 15  ;;  %s2095_s26 = sshll.u32 (!%p274_p3), %s2294_s18, 3 }
   0xb   : > { %p384_p7 = scmp.lt.s32.totalorder (!%p274_p3), %s2095_s26, 31  ;;  %s2385_s30 = sadd.s32 (!%p274_p3), 4294967295, %s2377_s25 }
   0xc   : > { %p349_p8 = scmp.gt.s32.totalorder (!%p274_p3), %s2385_s30, 0  ;;  %p2080_p9 = scmp.lt.s32.totalorder (!%p274_p3), %s2385_s30, 15 }
   0xd   : > { %s2213_s11 = sadd.s32 (!%p274_p3), 4, %s2377_s25  ;;  %p2098_p11 = scmp.ne.s32.totalorder (!%p274_p3), %s2294_s18, 0 }
   0xe   : > { %s2892_s19 = smov (!%p337_p5, %s2298_s19), 1  ;;  %vm408_vm0 = vsmask.f32 256  ;;  %s2894_s26 = smov (!%p384_p7, %s2095_s26), 31  ;;  %vm492_vm1 = vcmask 27648   ;;  %vm500_vm2 = vcmask 24576  }
   0xf   : > { %s340_s27 = scalar_select %p339_p6, %s2377_s25, 15  ;;  %vm493_vm3 = vsmask.f32 7938  ;;  %v495_v18 = vld [vmem:[#allocation2 + $0xc] sm:$0xf]  ;;  %vm2421_vm4 = vmand %vm500_vm2, %vm408_vm0 }
  0x10   : > { %s2382_s28 = sshll.u32 %s2892_s19, 5  ;;  %p2406_p10 = scmp.lt.s32.totalorder %s2213_s11, 15  ;;  %v502_v19 = vld [vmem:[#allocation2 + $0x14] sm:$0x1]  ;;  %v505_v21 = vld [vmem:[#allocation2 + $0x18] sm:$0xf]  ;;  %vm2434_vm5 = vmand %vm492_vm1, %vm493_vm3 }
  0x11   : > { %s2075_s29 = sshll.u32 %s340_s27, 1  ;;  %s387_s13 = sadd.s32 %s2382_s28, %s2894_s26  ;;  %v509_v32 = vld [vmem:[#allocation2 + $0x20] sm:$0x1]  ;;  %v512_v39 = vld [vmem:[#allocation2 + $0x24] sm:$0xf]  ;;  %vm2531_vm8 = vmand %vm500_vm2, %vm493_vm3 }
  0x12   : > { %s343_s6 = sadd.s32 %s2382_s28, %s2075_s29  ;;  %s2097_s15 = sshll.u32 %s387_s13, 3  ;;  %v516_v43 = vld [vmem:[#allocation2 + $0x2c] sm:$0x1]  ;;  %v519_v50 = vld [vmem:[#allocation2 + $0x30] sm:$0xf] }
  0x13   : > { %s2077_s7 = sshll.u32 %s343_s6, 3  ;;  %s2414_s19 = scalar_lea.vmem %s2867_s5, %s2097_s15  ;;  %vm409_vm6 = vsmask.f32 4368  ;;  %v523_v61 = vld [vmem:[#allocation2 + $0x38] sm:$0x1] }
  0x14   : > { %s345_s10 = scalar_lea.vmem %s2862_s0, %s2077_s7  ;;  %s2898_s11 = smov (!%p2406_p10, %s2213_s11), 15  ;;  %vm2487_vm7 = vmor %vm408_vm0, %vm409_vm6 }
  0x15   : > { %v392_v0 = vld [vmem:[%s345_s10] sm:$0xff]  ;;  %v393_v1 = vld [vmem:[%s345_s10 + $0x8] sm:$0xff]  ;;  %v394_v2 = vld [vmem:[%s345_s10 + $0x10] sm:$0xff]  ;;  %s350_s12 = scalar_select %p349_p8, %s2385_s30, 0 }
  0x16   : > { %v400_v3 = vpack.c.bf16 %v392_v0, %v392_v0  ;;  %v2394_v4 = vpack.c.bf16 %v393_v1, %v393_v1  ;;  %v402_v5 = vpack.c.bf16 %v394_v2, %v394_v2  ;;  %v395_v6 = vld [vmem:[%s345_s10 + $0x18] sm:$0xff]  ;;  %v396_v7 = vld [vmem:[%s345_s10 + $0x20] sm:$0xff]  ;;  %v397_v8 = vld [vmem:[%s345_s10 + $0x28] sm:$0xff]  ;;  %s2900_s11 = smov (!%p2406_p10, %s2898_s11), 15 }
  0x17   : > { %v2400_v9 = vpack.c.bf16 %v395_v6, %v395_v6  ;;  %v404_v10 = vpack.c.bf16 %v396_v7, %v396_v7  ;;  %v2402_v11 = vpack.c.bf16 %v397_v8, %v397_v8  ;;  %v398_v12 = vld [vmem:[%s345_s10 + $0x30] sm:$0xff]  ;;  %v399_v17 = vld [vmem:[%s345_s10 + $0x38] sm:$0xff]  ;;  %s2896_s12 = smov (!%p2080_p9, %s350_s12), 15  ;;  %s2092_s7 = sshll.u32 %s2900_s11, 1 }
  0x18   : > { %v412_v13 = vshrl.u32 %v400_v3, 16  ;;  %v415_v14 = vshll.u32 %v400_v3, 16  ;;  %v420_v15 = vshrl.u32 %v2394_v4, 16  ;;  %v429_v16 = vshrl.u32 %v402_v5, 16  ;;  %s2085_s26 = sshll.u32 %s2896_s12, 1  ;;  %s374_s8 = sadd.s32 %s2092_s7, %s2382_s28 }
  0x19   : > { %v432_v20 = vshll.u32 %v402_v5, 16  ;;  %v437_v22 = vshrl.u32 %v2400_v9, 16  ;;  %v446_v23 = vshrl.u32 %v404_v10, 16  ;;  %v449_v24 = vshll.u32 %v404_v10, 16  ;;  %s357_s25 = sadd.s32 %s2085_s26, %s2382_s28  ;;  %s2094_s9 = sshll.u32 %s374_s8, 3 }
  0x1a   : > { %v2417_v25 = vrot.slane %v412_v13, 7  ;;  %v2425_v27 = vrot.slane %v420_v15, 7  ;;  %v2427_v28 = vrot.slane %v429_v16, 7  ;;  %v454_v29 = vshrl.u32 %v2402_v11, 16  ;;  %s2087_s27 = sshll.u32 %s357_s25, 3  ;;  %s376_s11 = scalar_lea.vmem %s2864_s2, %s2094_s9 }
  0x1b   : > { %v439_v31 = vrot.slane %v437_v22, 7  ;;  %v2438_v33 = vrot.slane %v446_v23, 7  ;;  %v406_v34 = vpack.c.bf16 %v398_v12, %v398_v12  ;;  %v2440_v35 = vpack.c.bf16 %v399_v17, %v399_v17  ;;  %s359_s6 = scalar_lea.vmem %s2863_s1, %s2087_s27 }
  0x1c   : > { %v417_v36 = vor.u32 %v415_v14, %v2417_v25  ;;  %v427_v37 = vrot.slane %v2425_v27, 4  ;;  %v434_v38 = vor.u32 %v432_v20, %v2427_v28  ;;  %v2451_v40 = vrot.slane %v454_v29, 7  ;;  %v526_v56 = vld [vmem:[%s359_s6] sm:$0xff]  ;;  %v527_v57 = vld [vmem:[%s359_s6 + $0x8] sm:$0xff] }
  0x1d   : > { %v444_v41 = vrot.slane %v439_v31, 4  ;;  %v451_v42 = vor.u32 %v449_v24, %v2438_v33  ;;  %v463_v44 = vshrl.u32 %v406_v34, 16  ;;  %v466_v45 = vshll.u32 %v406_v34, 16  ;;  %v558_v20 = vld [vmem:[%s376_s11 + $0x8] sm:$0xff] }
  0x1e   : > { %v496_v46 = vsel %vm2434_vm5, %v417_v36, %v495_v18  ;;  %v503_v47 = vsel %vm2421_vm4, %v427_v37, %v502_v19  ;;  %v506_v48 = vsel %vm2434_vm5, %v434_v38, %v505_v21  ;;  %v461_v49 = vrot.slane %v2451_v40, 4  ;;  %v557_v19 = vld [vmem:[%s376_s11] sm:$0xff] }
  0x1f   : > { %497 = vst [vmem:[#allocation2 + $0xc] sm:$0xf] %v496_v46  ;;  %v510_v51 = vsel %vm2421_vm4, %v444_v41, %v509_v32  ;;  %v2464_v52 = vrot.slane %v463_v44, 7  ;;  %v471_v53 = vshrl.u32 %v2440_v35, 16  ;;  %v513_v54 = vsel %vm2434_vm5, %v451_v42, %v512_v39  ;;  %v582_v41 = vld [vmem:[#allocation2 + $0x3c] sm:$0xf] }
  0x20   : > { %504 = vst [vmem:[#allocation2 + $0x14] sm:$0x1] %v503_v47  ;;  %v517_v55 = vsel %vm2421_vm4, %v461_v49, %v516_v43  ;;  %v418_v58 = vrot.slane %v2417_v25, 4  ;;  %v528_v62 = vpack.c.bf16 %v526_v56, %v526_v56  ;;  %v529_v63 = vpack.c.bf16 %v527_v57, %v527_v57  ;;  %v554_v25 = vld [vmem:[#allocation2 + $0x8] sm:$0x1] }
  0x21   : > { %507 = vst [vmem:[#allocation2 + $0x18] sm:$0xf] %v506_v48  ;;  %v468_v59 = vor.u32 %v466_v45, %v2464_v52  ;;  %v473_v60 = vrot.slane %v471_v53, 7  ;;  %v423_v0 = vshll.u32 %v2394_v4, 16  ;;  %v435_v1 = vrot.slane %v2427_v28, 4 }
  0x22   : > { %511 = vst [vmem:[#allocation2 + $0x20] sm:$0x1] %v510_v51  ;;  %v440_v2 = vshll.u32 %v2400_v9, 16  ;;  %v531_v6 = vshrl.u32 %v528_v62, 16  ;;  %v534_v7 = vshll.u32 %v528_v62, 16  ;;  %v539_v10 = vshrl.u32 %v529_v63, 16 }
  0x23   : > { %514 = vst [vmem:[#allocation2 + $0x24] sm:$0xf] %v513_v54  ;;  %v520_v3 = vsel %vm2434_vm5, %v468_v59, %v519_v50  ;;  %v478_v5 = vrot.slane %v473_v60, 4  ;;  %v550_v4 = vld [vmem:[#allocation2] sm:$0xf]  ;;  %v425_v9 = vor.u32 %v423_v0, %v2425_v27  ;;  %v452_v13 = vrot.slane %v2438_v33, 4 }
  0x24   : > { %518 = vst [vmem:[#allocation2 + $0x2c] sm:$0x1] %v517_v55  ;;  %v442_v12 = vor.u32 %v440_v2, %v439_v31  ;;  %v533_v15 = vrot.slane %v531_v6, 7  ;;  %v457_v16 = vshll.u32 %v2402_v11, 16  ;;  %v469_v17 = vrot.slane %v2464_v52, 4 }
  0x25   : > { %521 = vst [vmem:[#allocation2 + $0x30] sm:$0xf] %v520_v3  ;;  %v524_v14 = vsel %vm2421_vm4, %v478_v5, %v523_v61  ;;  %v541_v18 = vrot.slane %v539_v10, 7  ;;  %v426_v21 = vsel %vm2487_vm7, %v418_v58, %v425_v9  ;;  %v474_v23 = vshll.u32 %v2440_v35, 16  ;;  %v586_v47 = vld [vmem:[#allocation2 + $0x44] sm:$0x1] }
  0x26   : > { %525 = vst [vmem:[#allocation2 + $0x38] sm:$0x1] %v524_v14  ;;  %v443_v22 = vsel %vm2487_vm7, %v435_v1, %v442_v12  ;;  %v536_v24 = vor.u32 %v534_v7, %v533_v15  ;;  %v559_v27 = vpack.c.bf16 %v557_v19, %v557_v19  ;;  %v560_v28 = vpack.c.bf16 %v558_v20, %v558_v20  ;;  %v592_v38 = vld [vmem:[#allocation2 + $0xc] sm:$0x1] }
  0x27   : > { %499 = vst.msk [vmem:[#allocation2 + $0x10] sm:$0xf] %vm492_vm1, %v426_v21  ;;  %v459_v11 = vor.u32 %v457_v16, %v2451_v40  ;;  %v546_v29 = vrot.slane %v541_v18, 4  ;;  %v476_v31 = vor.u32 %v474_v23, %v473_v60  ;;  %v537_v32 = vrot.slane %v533_v15, 4  ;;  %v611_v60 = vld [vmem:[#allocation2 + $0x14] sm:$0x1] }
  0x28   : > { %508 = vst.msk [vmem:[#allocation2 + $0x1c] sm:$0xf] %vm492_vm1, %v443_v22  ;;  %v542_v33 = vshll.u32 %v529_v63, 16  ;;  %v551_v34 = vsel %vm2434_vm5, %v536_v24, %v550_v4  ;;  %v562_v36 = vshrl.u32 %v559_v27, 16  ;;  %v565_v37 = vshll.u32 %v559_v27, 16 }
  0x29   : > { %v570_v35 = vshrl.u32 %v560_v28, 16  ;;  %552 = vst [vmem:[#allocation2] sm:$0xf] %v551_v34  ;;  %v555_v39 = vsel %vm2421_vm4, %v546_v29, %v554_v25  ;;  %v460_v40 = vsel %vm2487_vm7, %v452_v13, %v459_v11  ;;  %v477_v42 = vsel %vm2487_vm7, %v469_v17, %v476_v31  ;;  %v595_v54 = vld [vmem:[#allocation2 + $0x18] sm:$0x1] }
  0x2a   : > { %v544_v43 = vor.u32 %v542_v33, %v541_v18  ;;  %556 = vst [vmem:[#allocation2 + $0x8] sm:$0x1] %v555_v39  ;;  %v564_v44 = vrot.slane %v562_v36, 7  ;;  %v573_v46 = vshll.u32 %v560_v28, 16  ;;  %v593_v49 = vsel %vm2421_vm4, 0, %v592_v38 }
  0x2b   : > { %v572_v45 = vrot.slane %v570_v35, 7  ;;  %515 = vst.msk [vmem:[#allocation2 + $0x28] sm:$0xf] %vm492_vm1, %v460_v40  ;;  %v598_v58 = vld [vmem:[#allocation2 + $0x24] sm:$0x1]  ;;  %v596_v62 = vsel %vm2421_vm4, 0, %v595_v54 }
  0x2c   : > { %v545_v48 = vsel %vm2487_vm7, %v537_v32, %v544_v43  ;;  %v567_v50 = vor.u32 %v565_v37, %v564_v44  ;;  %522 = vst.msk [vmem:[#allocation2 + $0x34] sm:$0xf] %vm492_vm1, %v477_v42  ;;  %v568_v52 = vrot.slane %v564_v44, 4  ;;  %v601_v59 = vld [vmem:[#allocation2 + $0x30] sm:$0x1]  ;;  %v599_v0 = vsel %vm2421_vm4, 0, %v598_v58 }
  0x2d   : > { %v577_v51 = vrot.slane %v572_v45, 4  ;;  %v575_v53 = vor.u32 %v573_v46, %v572_v45  ;;  %553 = vst.msk [vmem:[#allocation2 + $0x4] sm:$0xf] %vm492_vm1, %v545_v48  ;;  %v602_v2 = vsel %vm2421_vm4, 0, %v601_v59  ;;  %v614_v5 = vld [vmem:[#allocation2 + $0x20] sm:$0x1] }
  0x2e   : > { %v583_v55 = vsel %vm2434_vm5, %v567_v50, %v582_v41  ;;  %594 = vst [vmem:[#allocation2 + $0xc] sm:$0x1] %v593_v49  ;;  %v612_v6 = vsel %vm2531_vm8, 0, %v611_v60  ;;  %v617_v7 = vld [vmem:[#allocation2 + $0x2c] sm:$0x1]  ;;  %v615_v10 = vsel %vm2531_vm8, 0, %v614_v5 }
  0x2f   : > { %v587_v56 = vsel %vm2421_vm4, %v577_v51, %v586_v47  ;;  %v576_v57 = vsel %vm2487_vm7, %v568_v52, %v575_v53  ;;  %584 = vst [vmem:[#allocation2 + $0x3c] sm:$0xf] %v583_v55  ;;  %v620_v8 = vld [vmem:[#allocation2 + $0x38] sm:$0x1]  ;;  %v618_v12 = vsel %vm2531_vm8, 0, %v617_v7 }
  0x30   : > { %588 = vst [vmem:[#allocation2 + $0x44] sm:$0x1] %v587_v56  ;;  %v589_v30 = vld [vmem:[#allocation2] sm:$0x1]  ;;  %v621_v14 = vsel %vm2531_vm8, 0, %v620_v8 }
  0x31   : > { %585 = vst.msk [vmem:[#allocation2 + $0x40] sm:$0xf] %vm492_vm1, %v576_v57  ;;  %v590_v63 = vsel %vm2421_vm4, 0, %v589_v30  ;;  %v608_v1 = vld [vmem:[#allocation2 + $0x8] sm:$0x1] }
  0x32   : > { %591 = vst [vmem:[#allocation2] sm:$0x1] %v590_v63  ;;  %v609_v3 = vsel %vm2531_vm8, 0, %v608_v1 }
  0x33   : > { %597 = vst [vmem:[#allocation2 + $0x18] sm:$0x1] %v596_v62 }
  0x34   : > { %600 = vst [vmem:[#allocation2 + $0x24] sm:$0x1] %v599_v0 }
  0x35   : > { %603 = vst [vmem:[#allocation2 + $0x30] sm:$0x1] %v602_v2 }
  0x36   : > { %v604_v4 = vld [vmem:[#allocation2 + $0x3c] sm:$0x1]  ;;  %610 = vst [vmem:[#allocation2 + $0x8] sm:$0x1] %v609_v3 }
  0x37   : > { %v605_v9 = vsel %vm2421_vm4, 0, %v604_v4  ;;  %613 = vst [vmem:[#allocation2 + $0x14] sm:$0x1] %v612_v6  ;;  %v623_v13 = vld [vmem:[#allocation2 + $0x44] sm:$0x1] }
  0x38   : > { %606 = vst [vmem:[#allocation2 + $0x3c] sm:$0x1] %v605_v9  ;;  %v624_v15 = vsel %vm2531_vm8, 0, %v623_v13  ;;  %629 = sbr.rel (%p2098_p11) target bundleno = 65 (0x41), region = 44 }
  0x39   : > { %616 = vst [vmem:[#allocation2 + $0x20] sm:$0x1] %v615_v10 }
  0x3a   : > { %619 = vst [vmem:[#allocation2 + $0x2c] sm:$0x1] %v618_v12 }
  0x3b   : > { %622 = vst [vmem:[#allocation2 + $0x38] sm:$0x1] %v621_v14 }
  0x3c   : > { %625 = vst [vmem:[#allocation2 + $0x44] sm:$0x1] %v624_v15 }
  0x3d   : > { %v2312_v26 = vmov 0  }
  0x3e   : > { %630 = vst.msk [vmem:[#allocation2] sm:$0xf] %vm492_vm1, %v2312_v26 }
  0x3f   : > { %631 = vst.msk [vmem:[#allocation2 + $0x4] sm:$0xf] %vm492_vm1, %v2312_v26 }
  0x40   : > { %633 = vst.msk [vmem:[#allocation2 + $0x8] sm:$0x1] %vm500_vm2, %v2312_v26 }
  0x41 PF: > { %p2099_p12 = scmp.ne.s32.totalorder %s2294_s18, 3 }
  0x43   : > { %637 = sbr.rel (%p2099_p12) target bundleno = 76 (0x4c), region = 48 }
  0x48   : > { %v2313_v16 = vmov 0  }
  0x49   : > { %638 = vst.msk [vmem:[#allocation2 + $0x3c] sm:$0xf] %vm492_vm1, %v2313_v16 }
  0x4a   : > { %639 = vst.msk [vmem:[#allocation2 + $0x40] sm:$0xf] %vm492_vm1, %v2313_v16 }
  0x4b   : > { %641 = vst.msk [vmem:[#allocation2 + $0x44] sm:$0x1] %vm500_vm2, %v2313_v16 }
  0x4c PF: > { %v650_v17 = vld [vmem:[%s2865_s3] sm:$0x3]  ;;  %vm684_vm9 = vcmask 1041408   ;;  %v2215_v18 = vld [vmem:[#allocation2 + $0xc] sm:$0xff]  ;;  %vm671_vm10 = vcmask 31744   ;;  %v2216_v19 = vld [vmem:[#allocation2 + $0x18] sm:$0xff] }
  0x4d   : > { %v686_v20 = vsel %vm684_vm9, %v650_v17, 0  ;;  %v2120_v21 = vld [vmem:[%s2865_s3 + $0x2] sm:$0x3]  ;;  %v2129_v22 = vld [vmem:[%s2865_s3 + $0x4] sm:$0x3]  ;;  %vm942_vm11 = vcmask 1042432  }
  0x4e   : > { %v2217_v23 = vld [vmem:[#allocation2 + $0x24] sm:$0xff]  ;;  %2226 = vmatpush.bf16.msra.mxu1 %v686_v20  ;;  %2227 = vmatpush.bf16.msra.mxu2 %v686_v20  ;;  %v863_v24 = vsel %vm684_vm9, %v2120_v21, 0  ;;  %v1000_v25 = vsel %vm684_vm9, %v2129_v22, 0  ;;  %v725_v29 = vld [vmem:[#allocation2] sm:$0xf]  ;;  %vm943_vm12 = vcmask 1046532  }
  0x4f   : > { %v2214_v27 = vld [vmem:[#allocation2] sm:$0xff]  ;;  %2228 = vmatpush.bf16.msra.mxu3 %v686_v20  ;;  %695 = vmatpush.bf16.msra.mxu0 %v686_v20  ;;  %v727_v32 = vld [vmem:[#allocation2 + $0x8] sm:$0x1]  ;;  %vm737_vm13 = vsmask.f32 3328  ;;  %v741_v33 = vshrl.u32 %v725_v29, 16  ;;  %vm2588_vm15 = vmor %vm942_vm11, %vm943_vm12 }
  0x50   : > { %v2134_v28 = vld [vmem:[%s2865_s3 + $0x6] sm:$0x3]  ;;  %vm738_vm14 = vsmask.f32 7440  ;;  %v744_v34 = vshll.u32 %v725_v29, 16  ;;  %v760_v38 = vshll.u32 %v727_v32, 16 }
  0x51   : > { %v1098_v11 = vsel %vm684_vm9, %v2134_v28, 0  ;;  %v726_v31 = vld [vmem:[#allocation2 + $0x4] sm:$0xf]  ;;  %2117 = vmatmul.msk.bf16.vlgmr.msra.gmra.mxu1 %vm671_vm10, %v2215_v18  ;;  %2118 = vmatmul.msk.bf16.vlgmr.msra.gmra.mxu2 %vm671_vm10, %v2216_v19  ;;  %v918_v35 = vld [vmem:[#allocation2] sm:$0xe]  ;;  %v743_v42 = vrot.slane %v741_v33, 4  ;;  %vm2608_vm0 = vmor %vm737_vm13, %vm738_vm14 }
  0x52   : > { %872 = vmatpush.bf16.msrb.mxu1 %v863_v24  ;;  %1009 = vmatpush.bf16.msrb.mxu2 %v1000_v25  ;;  %v750_v36 = vshll.u32 %v726_v31, 16  ;;  %v754_v37 = vshrl.u32 %v726_v31, 16  ;;  %v919_v39 = vld [vmem:[#allocation2 + $0x4] sm:$0xf]  ;;  %v920_v41 = vld [vmem:[#allocation2 + $0x8] sm:$0x1] }
  0x53   : > { %2119 = vmatmul.msk.bf16.vlgmr.msra.gmra.mxu3 %vm671_vm10, %v2217_v23  ;;  %v2125_v40 = vrot.slane %v918_v35, 9  ;;  %2116 = vmatmul.msk.bf16.vlgmr.msra.gmra.mxu0 %vm671_vm10, %v2214_v27  ;;  %v746_v43 = vrot.slane %v744_v34, 5  ;;  %v2164_v47 = vld [vmem:[%s2865_s3 + $0xa] sm:$0x3]  ;;  %v947_v48 = vrot.slane %v919_v39, 5  ;;  %v950_v49 = vrot.slane %v920_v41, 5 }
  0x54   : > { %1107 = vmatpush.bf16.msrb.mxu3 %v1098_v11  ;;  %v752_v44 = vrot.slane %v750_v36, 5  ;;  %v756_v45 = vrot.slane %v754_v37, 4  ;;  %v1422_v50 = vsel %vm684_vm9, %v2164_v47, 0  ;;  %v2169_v51 = vld [vmem:[%s2865_s3 + $0xc] sm:$0x3]  ;;  %v762_v54 = vrot.slane %v760_v38, 5 }
  0x55   : > { %v747_v52 = vor.u32 %v746_v43, %v743_v42  ;;  %v1521_v55 = vsel %vm684_vm9, %v2169_v51, 0  ;;  %v2155_v56 = vld [vmem:[%s2865_s3 + $0x8] sm:$0x3]  ;;  %v2190_v57 = vld [vmem:[%s2865_s3 + $0xe] sm:$0x3]  ;;  %v948_v59 = vsel %vm2588_vm15, %v2125_v40, %v947_v48  ;;  %v949_v60 = vrot.slane %v947_v48, 4 }
  0x56   : > { %v757_v53 = vor.u32 %v756_v45, %v752_v44  ;;  %1431 = vmatpush.bf16.msra.mxu1 %v1422_v50  ;;  %1530 = vmatpush.bf16.msra.mxu2 %v1521_v55  ;;  %v1288_v61 = vsel %vm684_vm9, %v2155_v56, 0  ;;  %v1711_v30 = vsel %vm684_vm9, %v2190_v57, 0  ;;  %v728_v62 = vld [vmem:[#allocation2 + $0xc] sm:$0xf]  ;;  %v975_v1 = vunpack.c.l.b16 %v948_v59  ;;  %v729_v2 = vld [vmem:[#allocation2 + $0x10] sm:$0xf] }
  0x57   : > { %v748_v63 = vrot.slane %v747_v52, 4  ;;  %1297 = vmatpush.bf16.msrb.mxu0 %v1288_v61  ;;  %v951_v3 = vsel %vm2588_vm15, %v949_v60, %v950_v49  ;;  %v765_v5 = vshrl.u32 %v728_v62, 16  ;;  %v768_v6 = vshll.u32 %v728_v62, 16  ;;  %v730_v9 = vld [vmem:[#allocation2 + $0x14] sm:$0x1]  ;;  %v2218_v11 = vld [vmem:[#allocation2 + $0xc] sm:$0xff] }
  0x58   : > { %v758_v0 = vrot.slane %v757_v53, 4  ;;  %1720 = vmatpush.bf16.msra.mxu3 %v1711_v30  ;;  %v774_v7 = vshll.u32 %v729_v2, 16  ;;  %v976_v10 = vunpack.c.l.b16 %v951_v3  ;;  %v778_v12 = vshrl.u32 %v729_v2, 16  ;;  %v922_v16 = vld [vmem:[#allocation2 + $0x10] sm:$0xf] }
  0x59   : > { %v753_v8 = vsel %vm2608_vm0, %v748_v63, %v752_v44  ;;  %v767_v15 = vrot.slane %v765_v5, 4  ;;  %v770_v26 = vrot.slane %v768_v6, 5  ;;  %v1153_v17 = vld [vmem:[#allocation2 + $0xc] sm:$0xf]  ;;  %v784_v21 = vshll.u32 %v730_v9, 16 }
  0x5a   : > { %v763_v4 = vsel %vm2608_vm0, %v758_v0, %v762_v54  ;;  %v838_v13 = vunpack.c.l.b16 %v753_v8  ;;  %v776_v18 = vrot.slane %v774_v7, 5  ;;  %v780_v19 = vrot.slane %v778_v12, 4  ;;  %v1154_v22 = vld [vmem:[#allocation2 + $0x10] sm:$0xf]  ;;  %v921_v25 = vld [vmem:[#allocation2 + $0xc] sm:$0xe] }
  0x5b   : > { %v839_v14 = vunpack.c.l.b16 %v763_v4  ;;  %v983_v20 = vpack.c.b16 %v976_v10, %v975_v1  ;;  %v771_v24 = vor.u32 %v770_v26, %v767_v15  ;;  %v954_v27 = vrot.slane %v922_v16, 5  ;;  %v923_v31 = vld [vmem:[#allocation2 + $0x14] sm:$0x1]  ;;  %v2199_v37 = vld [vmem:[%s2865_s3 + $0x10] sm:$0x3] }
  0x5c   : > { %v1166_v28 = vshrl.u32 %v1153_v17, 16  ;;  %v781_v29 = vor.u32 %v780_v19, %v776_v18  ;;  %v1169_v32 = vshll.u32 %v1153_v17, 16  ;;  %v1155_v33 = vld [vmem:[#allocation2 + $0x14] sm:$0x1]  ;;  %v1175_v36 = vshll.u32 %v1154_v22, 16 }
  0x5d   : > { %v846_v23 = vpack.c.b16 %v839_v14, %v838_v13  ;;  %v786_v35 = vrot.slane %v784_v21, 5  ;;  %v2126_v38 = vrot.slane %v921_v25, 9  ;;  %v1179_v41 = vshrl.u32 %v1154_v22, 16  ;;  %v731_v40 = vld [vmem:[#allocation2 + $0x18] sm:$0xf] }
  0x5e   : > { %v1168_v34 = vrot.slane %v1166_v28, 4  ;;  %v1171_v39 = vrot.slane %v1169_v32, 5  ;;  %v772_v42 = vrot.slane %v771_v24, 4  ;;  %v956_v43 = vrot.slane %v954_v27, 4  ;;  %v732_v51 = vld [vmem:[#allocation2 + $0x1c] sm:$0xf] }
  0x5f   : > { %v957_v44 = vrot.slane %v923_v31, 5  ;;  %v1177_v45 = vrot.slane %v1175_v36, 5  ;;  %v782_v47 = vrot.slane %v781_v29, 4  ;;  %v1181_v49 = vrot.slane %v1179_v41, 4  ;;  %v1156_v2 = vld [vmem:[#allocation2 + $0x18] sm:$0xf] }
  0x60   : > { %v1172_v48 = vor.u32 %v1171_v39, %v1168_v34  ;;  %v1185_v50 = vshll.u32 %v1155_v33, 16  ;;  %v1845_v52 = vsel %vm684_vm9, %v2199_v37, 0  ;;  %v789_v53 = vshrl.u32 %v731_v40, 16  ;;  %v1157_v8 = vld [vmem:[#allocation2 + $0x1c] sm:$0xf] }
  0x61   : > { %2121 = vmatmul.msk.bf16.vlgmr.msrb.gmra.mxu1 %vm671_vm10, %v846_v23  ;;  %2130 = vmatmul.msk.bf16.vlgmr.msrb.gmra.mxu2 %vm671_vm10, %v983_v20  ;;  %v792_v54 = vshll.u32 %v731_v40, 16  ;;  %v955_v55 = vsel %vm2588_vm15, %v2126_v38, %v954_v27  ;;  %v1182_v57 = vor.u32 %v1181_v49, %v1177_v45  ;;  %v777_v60 = vsel %vm2608_vm0, %v772_v42, %v776_v18  ;;  %v733_v9 = vld [vmem:[#allocation2 + $0x20] sm:$0x1]  ;;  %v925_v16 = vld [vmem:[#allocation2 + $0x1c] sm:$0xf] }
  0x62   : > { %v1173_v56 = vrot.slane %v1172_v48, 4  ;;  %v1187_v59 = vrot.slane %v1185_v50, 5  ;;  %1854 = vmatpush.bf16.msra.mxu0 %v1845_v52  ;;  %v798_v61 = vshll.u32 %v732_v51, 16  ;;  %v802_v30 = vshrl.u32 %v732_v51, 16  ;;  %v924_v23 = vld [vmem:[#allocation2 + $0x18] sm:$0xe] }
  0x63   : > { %2151 = vmatmul.msk.bf16.vlgmr.msrb.gmra.mxu3 %vm671_vm10, %v2218_v11  ;;  %v787_v62 = vsel %vm2608_vm0, %v782_v47, %v786_v35  ;;  %v958_v63 = vsel %vm2588_vm15, %v956_v43, %v957_v44  ;;  %v1183_v1 = vrot.slane %v1182_v57, 4  ;;  %v977_v3 = vunpack.c.l.b16 %v955_v55  ;;  %v1158_v24 = vld [vmem:[#allocation2 + $0x20] sm:$0x1]  ;;  %v2219_v36 = vld [vmem:[#allocation2 + $0x18] sm:$0xff]  ;;  %v734_v47 = vld [vmem:[#allocation2 + $0x24] sm:$0xf] }
  0x64   : > { %v1178_v0 = vsel %vm2608_vm0, %v1173_v56, %v1177_v45  ;;  %v791_v6 = vrot.slane %v789_v53, 4  ;;  %v794_v7 = vrot.slane %v792_v54, 5  ;;  %v840_v4 = vunpack.c.l.b16 %v777_v60  ;;  %v926_v32 = vld [vmem:[#allocation2 + $0x20] sm:$0x1]  ;;  %v735_v50 = vld [vmem:[#allocation2 + $0x28] sm:$0xf] }
  0x65   : > { %v1263_v5 = vunpack.c.l.b16 %v1178_v0  ;;  %v1188_v10 = vsel %vm2608_vm0, %v1183_v1, %v1187_v59  ;;  %v800_v12 = vrot.slane %v798_v61, 5  ;;  %v804_v13 = vrot.slane %v802_v30, 4  ;;  %v1159_v56 = vld [vmem:[#allocation2 + $0x24] sm:$0xf]  ;;  %v1160_v30 = vld [vmem:[#allocation2 + $0x28] sm:$0xf] }
  0x66   : > { %v841_v14 = vunpack.c.l.b16 %v787_v62  ;;  %v978_v15 = vunpack.c.l.b16 %v958_v63  ;;  %v1264_v26 = vunpack.c.l.b16 %v1188_v10  ;;  %v1190_v17 = vshrl.u32 %v1156_v2, 16  ;;  %v1161_v10 = vld [vmem:[#allocation2 + $0x2c] sm:$0x1] }
  0x67   : > { %v1193_v18 = vshll.u32 %v1156_v2, 16  ;;  %v1199_v19 = vshll.u32 %v1157_v8, 16  ;;  %v795_v21 = vor.u32 %v794_v7, %v791_v6  ;;  %v808_v22 = vshll.u32 %v733_v9, 16 }
  0x68   : > { %v1271_v20 = vpack.c.b16 %v1264_v26, %v1263_v5  ;;  %v805_v25 = vor.u32 %v804_v13, %v800_v12  ;;  %v961_v27 = vrot.slane %v925_v16, 5  ;;  %v1192_v28 = vrot.slane %v1190_v17, 4 }
  0x69   : > { %v1195_v11 = vrot.slane %v1193_v18, 5  ;;  %v847_v29 = vpack.c.b16 %v841_v14, %v840_v4  ;;  %v984_v31 = vpack.c.b16 %v978_v15, %v977_v3  ;;  %v1201_v33 = vrot.slane %v1199_v19, 5  ;;  %v928_v18 = vld [vmem:[#allocation2 + $0x28] sm:$0xf] }
  0x6a   : > { %2156 = vmatmul.msk.bf16.vlgmr.msrb.gmra.mxu0 %vm671_vm10, %v1271_v20  ;;  %v1203_v34 = vshrl.u32 %v1157_v8, 16  ;;  %v2127_v37 = vrot.slane %v924_v23, 9  ;;  %v1209_v38 = vshll.u32 %v1158_v24, 16  ;;  %v796_v39 = vrot.slane %v795_v21, 4 }
  0x6b   : > { %v1196_v35 = vor.u32 %v1195_v11, %v1192_v28  ;;  %v810_v41 = vrot.slane %v808_v22, 5  ;;  %v806_v42 = vrot.slane %v805_v25, 4  ;;  %v963_v43 = vrot.slane %v961_v27, 4 }
  0x6c   : > { %v1205_v40 = vrot.slane %v1203_v34, 4  ;;  %v964_v44 = vrot.slane %v926_v32, 5  ;;  %v1211_v49 = vrot.slane %v1209_v38, 5  ;;  %v962_v51 = vsel %vm2588_vm15, %v2127_v37, %v961_v27  ;;  %v929_v32 = vld [vmem:[#allocation2 + $0x2c] sm:$0x1]  ;;  %v2220_v34 = vld [vmem:[#allocation2 + $0x24] sm:$0xff] }
  0x6d   : > { %v1197_v45 = vrot.slane %v1196_v35, 4  ;;  %v801_v53 = vsel %vm2608_vm0, %v796_v39, %v800_v12  ;;  %v813_v55 = vshrl.u32 %v734_v47, 16  ;;  %v811_v57 = vsel %vm2608_vm0, %v806_v42, %v810_v41  ;;  %v736_v12 = vld [vmem:[#allocation2 + $0x2c] sm:$0x1]  ;;  %v1162_v35 = vld [vmem:[#allocation2 + $0x30] sm:$0xf] }
  0x6e   : > { %v1206_v48 = vor.u32 %v1205_v40, %v1201_v33  ;;  %v965_v59 = vsel %vm2588_vm15, %v963_v43, %v964_v44  ;;  %v816_v60 = vshll.u32 %v734_v47, 16  ;;  %v822_v61 = vshll.u32 %v735_v50, 16  ;;  %v1163_v39 = vld [vmem:[#allocation2 + $0x34] sm:$0xf] }
  0x6f   : > { %v1202_v52 = vsel %vm2608_vm0, %v1197_v45, %v1201_v33  ;;  %v979_v62 = vunpack.c.l.b16 %v962_v51  ;;  %v826_v1 = vshrl.u32 %v735_v50, 16  ;;  %v842_v2 = vunpack.c.l.b16 %v801_v53 }
  0x70   : > { %v1207_v54 = vrot.slane %v1206_v48, 4  ;;  %v1265_v0 = vunpack.c.l.b16 %v1202_v52  ;;  %v1214_v5 = vshrl.u32 %v1159_v56, 16  ;;  %v1217_v6 = vshll.u32 %v1159_v56, 16  ;;  %v1577_v56 = vld [vmem:[#allocation2 + $0x1c] sm:$0xf] }
  0x71   : > { %2122 = vmatmul.msk.bf16.gmra.mxu1 %vm671_vm10, %v847_v29  ;;  %2131 = vmatmul.msk.bf16.gmra.mxu2 %vm671_vm10, %v984_v31  ;;  %v843_v7 = vunpack.c.l.b16 %v811_v57  ;;  %v980_v8 = vunpack.c.l.b16 %v965_v59  ;;  %v815_v4 = vrot.slane %v813_v55, 4  ;;  %v1223_v9 = vshll.u32 %v1160_v30, 16  ;;  %v927_v31 = vld [vmem:[#allocation2 + $0x24] sm:$0xe]  ;;  %v1576_v55 = vld [vmem:[#allocation2 + $0x18] sm:$0xf] }
  0x72   : > { %v1212_v63 = vsel %vm2608_vm0, %v1207_v54, %v1211_v49  ;;  %v818_v13 = vrot.slane %v816_v60, 5  ;;  %v824_v14 = vrot.slane %v822_v61, 5  ;;  %v1216_v15 = vrot.slane %v1214_v5, 4 }
  0x73   : > { %2152 = vmatmul.msk.bf16.gmra.mxu3 %vm671_vm10, %v2219_v36  ;;  %v1266_v3 = vunpack.c.l.b16 %v1212_v63  ;;  %v1219_v26 = vrot.slane %v1217_v6, 5  ;;  %v828_v17 = vrot.slane %v826_v1, 4  ;;  %v1225_v19 = vrot.slane %v1223_v9, 5  ;;  %v1164_v1 = vld [vmem:[#allocation2 + $0x38] sm:$0x1] }
  0x74   : > { %v1227_v20 = vshrl.u32 %v1160_v30, 16  ;;  %v1233_v22 = vshll.u32 %v1161_v10, 16  ;;  %v985_v24 = vpack.c.b16 %v980_v8, %v979_v62  ;;  %v832_v25 = vshll.u32 %v736_v12, 16 }
  0x75   : > { %v1272_v16 = vpack.c.b16 %v1266_v3, %v1265_v0  ;;  %v1220_v21 = vor.u32 %v1219_v26, %v1216_v15  ;;  %v968_v27 = vrot.slane %v928_v18, 5  ;;  %v848_v28 = vpack.c.b16 %v843_v7, %v842_v2  ;;  %v1344_v15 = vld [vmem:[#allocation2 + $0x10] sm:$0xf] }
  0x76   : > { %v1229_v23 = vrot.slane %v1227_v20, 4  ;;  %v819_v11 = vor.u32 %v818_v13, %v815_v4  ;;  %v829_v29 = vor.u32 %v828_v17, %v824_v14  ;;  %v1235_v37 = vrot.slane %v1233_v22, 5  ;;  %v2221_v22 = vld [vmem:[#allocation2 + $0x30] sm:$0xff] }
  0x77   : > { %v1221_v36 = vrot.slane %v1220_v21, 4  ;;  %v834_v41 = vrot.slane %v832_v25, 5  ;;  %v2128_v40 = vrot.slane %v927_v31, 9  ;;  %v970_v42 = vrot.slane %v968_v27, 4 }
  0x78   : > { %v1230_v33 = vor.u32 %v1229_v23, %v1225_v19  ;;  %v971_v43 = vrot.slane %v929_v32, 5  ;;  %v820_v44 = vrot.slane %v819_v11, 4  ;;  %v830_v45 = vrot.slane %v829_v29, 4  ;;  %v1343_v23 = vld [vmem:[#allocation2 + $0xc] sm:$0xe] }
  0x79   : > { %v1238_v47 = vshrl.u32 %v1162_v35, 16  ;;  %v1241_v48 = vshll.u32 %v1162_v35, 16  ;;  %v1226_v49 = vsel %vm2608_vm0, %v1221_v36, %v1225_v19  ;;  %v1247_v51 = vshll.u32 %v1163_v39, 16  ;;  %v1578_v19 = vld [vmem:[#allocation2 + $0x20] sm:$0x1] }
  0x7a   : > { %2157 = vmatmul.msk.bf16.gmra.mxu0 %vm671_vm10, %v1272_v16  ;;  %v1231_v38 = vrot.slane %v1230_v33, 4  ;;  %v1251_v52 = vshrl.u32 %v1163_v39, 16  ;;  %v969_v53 = vsel %vm2588_vm15, %v2128_v40, %v968_v27  ;;  %v972_v54 = vsel %vm2588_vm15, %v970_v42, %v971_v43  ;;  %v1345_v11 = vld [vmem:[#allocation2 + $0x14] sm:$0x1]  ;;  %v1580_v36 = vld [vmem:[#allocation2 + $0x28] sm:$0xf] }
  0x7b   : > { %v825_v57 = vsel %vm2608_vm0, %v820_v44, %v824_v14  ;;  %v835_v59 = vsel %vm2608_vm0, %v830_v45, %v834_v41  ;;  %v1267_v60 = vunpack.c.l.b16 %v1226_v49  ;;  %v1240_v30 = vrot.slane %v1238_v47, 4 }
  0x7c   : > { %v1236_v50 = vsel %vm2608_vm0, %v1231_v38, %v1235_v37  ;;  %v1243_v62 = vrot.slane %v1241_v48, 5  ;;  %v1249_v63 = vrot.slane %v1247_v51, 5  ;;  %v1253_v0 = vrot.slane %v1251_v52, 4  ;;  %v1767_v52 = vld [vmem:[#allocation2 + $0x1c] sm:$0xf] }
  0x7d   : > { %v1268_v61 = vunpack.c.l.b16 %v1236_v50  ;;  %v1589_v2 = vshrl.u32 %v1576_v55, 16  ;;  %v1592_v3 = vshll.u32 %v1576_v55, 16  ;;  %v1598_v5 = vshll.u32 %v1577_v56, 16  ;;  %v1347_v55 = vld [vmem:[#allocation2 + $0x1c] sm:$0xf] }
  0x7e   : > { %v1602_v6 = vshrl.u32 %v1577_v56, 16  ;;  %v981_v7 = vunpack.c.l.b16 %v969_v53  ;;  %v844_v8 = vunpack.c.l.b16 %v825_v57  ;;  %v845_v4 = vunpack.c.l.b16 %v835_v59 }
  0x7f   : > { %v982_v10 = vunpack.c.l.b16 %v972_v54  ;;  %v1273_v9 = vpack.c.b16 %v1268_v61, %v1267_v60  ;;  %v1244_v12 = vor.u32 %v1243_v62, %v1240_v30  ;;  %v1254_v13 = vor.u32 %v1253_v0, %v1249_v63 }
  0x80   : > { %v1257_v14 = vshll.u32 %v1164_v1, 16  ;;  %v1591_v26 = vrot.slane %v1589_v2, 4  ;;  %v1594_v16 = vrot.slane %v1592_v3, 5  ;;  %v1600_v17 = vrot.slane %v1598_v5, 5  ;;  %v1766_v3 = vld [vmem:[#allocation2 + $0x18] sm:$0xe] }
  0x81   : > { %2123 = vmatmul.msk.bf16.gmra.mxu1 %vm671_vm10, %v848_v28  ;;  %2132 = vmatmul.msk.bf16.gmra.mxu2 %vm671_vm10, %v985_v24  ;;  %v1604_v18 = vrot.slane %v1602_v6, 4  ;;  %v849_v20 = vpack.c.b16 %v845_v4, %v844_v8  ;;  %v986_v21 = vpack.c.b16 %v982_v10, %v981_v7  ;;  %v1369_v24 = vrot.slane %v1344_v15, 5  ;;  %v1768_v5 = vld [vmem:[#allocation2 + $0x20] sm:$0x1]  ;;  %v1346_v7 = vld [vmem:[#allocation2 + $0x18] sm:$0xe] }
  0x82   : > { %v1245_v25 = vrot.slane %v1244_v12, 4  ;;  %v1255_v27 = vrot.slane %v1254_v13, 4  ;;  %v1259_v28 = vrot.slane %v1257_v14, 5  ;;  %v1595_v29 = vor.u32 %v1594_v16, %v1591_v26  ;;  %v1348_v8 = vld [vmem:[#allocation2 + $0x20] sm:$0x1]  ;;  %v2222_v13 = vld [vmem:[#allocation2 + $0x18] sm:$0xff] }
  0x83   : > { %2153 = vmatmul.msk.bf16.gmra.mxu3 %vm671_vm10, %v2220_v34  ;;  %v1605_v31 = vor.u32 %v1604_v18, %v1600_v17  ;;  %v1608_v32 = vshll.u32 %v1578_v19, 16  ;;  %v2160_v33 = vrot.slane %v1343_v23, 9  ;;  %v1579_v34 = vld [vmem:[#allocation2 + $0x24] sm:$0xf]  ;;  %v1371_v37 = vrot.slane %v1369_v24, 4 }
  0x84   : > { %v1372_v35 = vrot.slane %v1345_v11, 5  ;;  %v1250_v38 = vsel %vm2608_vm0, %v1245_v25, %v1249_v63  ;;  %v1260_v39 = vsel %vm2608_vm0, %v1255_v27, %v1259_v28  ;;  %v1596_v41 = vrot.slane %v1595_v29, 4  ;;  %v1581_v63 = vld [vmem:[#allocation2 + $0x2c] sm:$0x1]  ;;  %v1582_v25 = vld [vmem:[#allocation2 + $0x30] sm:$0xf] }
  0x85   : > { %v1606_v40 = vrot.slane %v1605_v31, 4  ;;  %v1610_v42 = vrot.slane %v1608_v32, 5  ;;  %v1613_v43 = vshrl.u32 %v1579_v34, 16  ;;  %v1616_v44 = vshll.u32 %v1579_v34, 16  ;;  %v1583_v27 = vld [vmem:[#allocation2 + $0x34] sm:$0xf] }
  0x86   : > { %v1622_v45 = vshll.u32 %v1580_v36, 16  ;;  %v1626_v47 = vshrl.u32 %v1580_v36, 16  ;;  %v1269_v48 = vunpack.c.l.b16 %v1250_v38  ;;  %v1270_v49 = vunpack.c.l.b16 %v1260_v39  ;;  %v1770_v39 = vld [vmem:[#allocation2 + $0x28] sm:$0xf] }
  0x87   : > { %v1370_v50 = vsel %vm2588_vm15, %v2160_v33, %v1369_v24  ;;  %v1373_v51 = vsel %vm2588_vm15, %v1371_v37, %v1372_v35  ;;  %v1601_v53 = vsel %vm2608_vm0, %v1596_v41, %v1600_v17  ;;  %v1611_v54 = vsel %vm2608_vm0, %v1606_v40, %v1610_v42 }
  0x88   : > { %v1615_v56 = vrot.slane %v1613_v43, 4  ;;  %v1618_v57 = vrot.slane %v1616_v44, 5  ;;  %v1624_v59 = vrot.slane %v1622_v45, 5  ;;  %v1628_v60 = vrot.slane %v1626_v47, 4 }
  0x89   : > { %v1397_v61 = vunpack.c.l.b16 %v1370_v50  ;;  %v1398_v30 = vunpack.c.l.b16 %v1373_v51  ;;  %v1274_v62 = vpack.c.b16 %v1270_v49, %v1269_v48  ;;  %v1792_v0 = vrot.slane %v1767_v52, 5  ;;  %v1350_v49 = vld [vmem:[#allocation2 + $0x28] sm:$0xf]  ;;  %v1584_v51 = vld [vmem:[#allocation2 + $0x38] sm:$0x1] }
  0x8a   : > { %2158 = vmatmul.msk.bf16.gmra.mxu0 %vm671_vm10, %v1273_v9  ;;  %v1686_v1 = vunpack.c.l.b16 %v1601_v53  ;;  %v1687_v2 = vunpack.c.l.b16 %v1611_v54  ;;  %v1376_v6 = vrot.slane %v1347_v55, 5  ;;  %v1619_v4 = vor.u32 %v1618_v57, %v1615_v56  ;;  %v1769_v52 = vld [vmem:[#allocation2 + $0x24] sm:$0xe]  ;;  %v1771_v53 = vld [vmem:[#allocation2 + $0x2c] sm:$0x1] }
  0x8b   : > { %v1629_v10 = vor.u32 %v1628_v60, %v1624_v59  ;;  %v1632_v9 = vshll.u32 %v1581_v63, 16  ;;  %v1405_v12 = vpack.c.b16 %v1398_v30, %v1397_v61  ;;  %v2195_v14 = vrot.slane %v1766_v3, 9  ;;  %v2223_v55 = vld [vmem:[#allocation2 + $0x24] sm:$0xff]  ;;  %v1351_v30 = vld [vmem:[#allocation2 + $0x2c] sm:$0x1] }
  0x8c   : > { %v1794_v15 = vrot.slane %v1792_v0, 4  ;;  %v1795_v26 = vrot.slane %v1768_v5, 5  ;;  %v1694_v16 = vpack.c.b16 %v1687_v2, %v1686_v1  ;;  %v2161_v17 = vrot.slane %v1346_v7, 9  ;;  %v1349_v57 = vld [vmem:[#allocation2 + $0x24] sm:$0xe] }
  0x8d   : > { %v1378_v18 = vrot.slane %v1376_v6, 4  ;;  %v1379_v19 = vrot.slane %v1348_v8, 5  ;;  %v1793_v23 = vsel %vm2588_vm15, %v2195_v14, %v1792_v0  ;;  %v1637_v34 = vshrl.u32 %v1582_v25, 16 }
  0x8e   : > { %v1796_v24 = vsel %vm2588_vm15, %v1794_v15, %v1795_v26  ;;  %v1377_v28 = vsel %vm2588_vm15, %v2161_v17, %v1376_v6  ;;  %v1820_v32 = vunpack.c.l.b16 %v1793_v23  ;;  %v1640_v36 = vshll.u32 %v1582_v25, 16 }
  0x8f   : > { %v1380_v11 = vsel %vm2588_vm15, %v1378_v18, %v1379_v19  ;;  %v1821_v33 = vunpack.c.l.b16 %v1796_v24  ;;  %v1646_v37 = vshll.u32 %v1583_v27, 16  ;;  %v1650_v35 = vshrl.u32 %v1583_v27, 16 }
  0x90   : > { %v1399_v38 = vunpack.c.l.b16 %v1377_v28  ;;  %v1400_v41 = vunpack.c.l.b16 %v1380_v11  ;;  %v1639_v44 = vrot.slane %v1637_v34, 4  ;;  %v1642_v45 = vrot.slane %v1640_v36, 5  ;;  %v1353_v11 = vld [vmem:[#allocation2 + $0x34] sm:$0xf]  ;;  %v1772_v36 = vld [vmem:[#allocation2 + $0x30] sm:$0xe] }
  0x91   : > { %2124 = vmatmul.msk.bf16.gmra.mxu1 %vm671_vm10, %v849_v20  ;;  %2133 = vmatmul.msk.bf16.gmra.mxu2 %vm671_vm10, %v986_v21  ;;  %v1620_v20 = vrot.slane %v1619_v4, 4  ;;  %v1630_v21 = vrot.slane %v1629_v10, 4  ;;  %v1828_v43 = vpack.c.b16 %v1821_v33, %v1820_v32  ;;  %v1648_v47 = vrot.slane %v1646_v37, 5  ;;  %v1774_v37 = vld [vmem:[#allocation2 + $0x38] sm:$0x1] }
  0x92   : > { %v1652_v48 = vrot.slane %v1650_v35, 4  ;;  %v1799_v50 = vrot.slane %v1770_v39, 5  ;;  %v1406_v54 = vpack.c.b16 %v1400_v41, %v1399_v38  ;;  %v1643_v60 = vor.u32 %v1642_v45, %v1639_v44  ;;  %v1587_v35 = vld [vmem:[#allocation2 + $0x44] sm:$0x1]  ;;  %v2224_v39 = vld [vmem:[#allocation2 + $0x30] sm:$0xff] }
  0x93   : > { %2154 = vmatmul.msk.bf16.gmra.mxu3 %vm671_vm10, %v2221_v22  ;;  %v1634_v22 = vrot.slane %v1632_v9, 5  ;;  %v1625_v29 = vsel %vm2608_vm0, %v1620_v20, %v1624_v59  ;;  %v1383_v59 = vrot.slane %v1350_v49, 5  ;;  %v2196_v63 = vrot.slane %v1769_v52, 9  ;;  %v1585_v9 = vld [vmem:[#allocation2 + $0x3c] sm:$0xf] }
  0x94   : > { %v1688_v40 = vunpack.c.l.b16 %v1625_v29  ;;  %v1653_v61 = vor.u32 %v1652_v48, %v1648_v47  ;;  %v1801_v0 = vrot.slane %v1799_v50, 4  ;;  %v1802_v1 = vrot.slane %v1771_v53, 5 }
  0x95   : > { %v1635_v31 = vsel %vm2608_vm0, %v1630_v21, %v1634_v22  ;;  %v2162_v2 = vrot.slane %v1349_v57, 9  ;;  %v1385_v3 = vrot.slane %v1383_v59, 4  ;;  %v1386_v5 = vrot.slane %v1351_v30, 5  ;;  %v1773_v22 = vld [vmem:[#allocation2 + $0x34] sm:$0xf] }
  0x96   : > { %v1689_v42 = vunpack.c.l.b16 %v1635_v31  ;;  %v1644_v6 = vrot.slane %v1643_v60, 4  ;;  %v1654_v7 = vrot.slane %v1653_v61, 4  ;;  %v1800_v4 = vsel %vm2588_vm15, %v2196_v63, %v1799_v50 }
  0x97   : > { %v1803_v10 = vsel %vm2588_vm15, %v1801_v0, %v1802_v1  ;;  %v1387_v14 = vsel %vm2588_vm15, %v1385_v3, %v1386_v5  ;;  %v1822_v15 = vunpack.c.l.b16 %v1800_v4  ;;  %v1661_v18 = vshrl.u32 %v1585_v9, 16  ;;  %v1776_v1 = vld [vmem:[#allocation2 + $0x40] sm:$0xf]  ;;  %v1775_v4 = vld [vmem:[#allocation2 + $0x3c] sm:$0xe] }
  0x98   : > { %v1695_v56 = vpack.c.b16 %v1689_v42, %v1688_v40  ;;  %v1823_v26 = vunpack.c.l.b16 %v1803_v10  ;;  %v1664_v19 = vshll.u32 %v1585_v9, 16  ;;  %v1402_v24 = vunpack.c.l.b16 %v1387_v14  ;;  %v1352_v40 = vld [vmem:[#allocation2 + $0x30] sm:$0xe]  ;;  %v1777_v10 = vld [vmem:[#allocation2 + $0x44] sm:$0x1] }
  0x99   : > { %v1663_v29 = vrot.slane %v1661_v18, 4  ;;  %v1806_v32 = vrot.slane %v1773_v22, 5  ;;  %v1390_v42 = vrot.slane %v1353_v11, 5  ;;  %v1809_v45 = vrot.slane %v1774_v37, 5 }
  0x9a   : > { %2159 = vmatmul.msk.bf16.gmra.mxu0 %vm671_vm10, %v1274_v62  ;;  %v1656_v62 = vshll.u32 %v1584_v51, 16  ;;  %v1829_v28 = vpack.c.b16 %v1823_v26, %v1822_v15  ;;  %v1666_v31 = vrot.slane %v1664_v19, 5  ;;  %v1680_v50 = vshll.u32 %v1587_v35, 16 }
  0x9b   : > { %v1808_v44 = vrot.slane %v1806_v32, 4  ;;  %v2163_v51 = vrot.slane %v1352_v40, 9  ;;  %v1392_v52 = vrot.slane %v1390_v42, 4  ;;  %v2198_v15 = vrot.slane %v1775_v4, 9 }
  0x9c   : > { %v1658_v8 = vrot.slane %v1656_v62, 5  ;;  %v1667_v48 = vor.u32 %v1666_v31, %v1663_v29 }
  0x9d   : > { %v1391_v30 = vsel %vm2588_vm15, %v2163_v51, %v1390_v42 }
  0x9e   : > { %v1659_v17 = vsel %vm2608_vm0, %v1654_v7, %v1658_v8  ;;  %v1813_v8 = vrot.slane %v1776_v1, 5 }
  0x9f   : > { %v1691_v27 = vunpack.c.l.b16 %v1659_v17 }
  0xa0   : > { %v1815_v26 = vrot.slane %v1813_v8, 4  ;;  %v1814_v17 = vsel %vm2588_vm15, %v2198_v15, %v1813_v8 }
  0xa1   : > { %2165 = vmatmul.msk.bf16.vlgmr.msra.gmra.mxu1 %vm671_vm10, %v1405_v12  ;;  %2186 = vmatmul.msk.bf16.vlgmr.msra.gmra.mxu2 %vm671_vm10, %v2222_v13  ;;  %v1586_v12 = vld [vmem:[#allocation2 + $0x40] sm:$0xf]  ;;  %v1384_v13 = vsel %vm2588_vm15, %v2162_v2, %v1383_v59  ;;  %v1682_v59 = vrot.slane %v1680_v50, 5  ;;  %v1403_v2 = vunpack.c.l.b16 %v1391_v30 }
  0xa2   : > { %v1670_v20 = vshll.u32 %v1586_v12, 16  ;;  %v1674_v21 = vshrl.u32 %v1586_v12, 16  ;;  %v1401_v23 = vunpack.c.l.b16 %v1384_v13  ;;  %v2225_v12 = vld [vmem:[#allocation2 + $0x3c] sm:$0xff] }
  0xa3   : > { %2191 = vmatmul.msk.bf16.vlgmr.msra.gmra.mxu3 %vm671_vm10, %v1694_v16  ;;  %v1649_v16 = vsel %vm2608_vm0, %v1644_v6, %v1648_v47  ;;  %v1354_v47 = vld [vmem:[#allocation2 + $0x38] sm:$0x1] }
  0xa4   : > { %v1690_v25 = vunpack.c.l.b16 %v1649_v16  ;;  %v1672_v33 = vrot.slane %v1670_v20, 5  ;;  %v1676_v34 = vrot.slane %v1674_v21, 4  ;;  %v1407_v38 = vpack.c.b16 %v1402_v24, %v1401_v23 }
  0xa5   : > { %v1393_v53 = vrot.slane %v1354_v47, 5  ;;  %v1816_v16 = vrot.slane %v1777_v10, 5  ;;  %v1826_v21 = vunpack.c.l.b16 %v1814_v17 }
  0xa6   : > { %v1696_v41 = vpack.c.b16 %v1691_v27, %v1690_v25  ;;  %v1677_v49 = vor.u32 %v1676_v34, %v1672_v33 }
  0xa7   : > { %v1394_v62 = vsel %vm2588_vm15, %v1392_v52, %v1393_v53  ;;  %v1817_v18 = vsel %vm2588_vm15, %v1815_v26, %v1816_v16 }
  0xa8   : > { %v1678_v57 = vrot.slane %v1677_v49, 4  ;;  %v1404_v3 = vunpack.c.l.b16 %v1394_v62  ;;  %v1827_v22 = vunpack.c.l.b16 %v1817_v18 }
  0xaa   : > { %2200 = vmatmul.msk.bf16.vlgmr.msra.gmra.mxu0 %vm671_vm10, %v1828_v43  ;;  %v2197_v43 = vrot.slane %v1772_v36, 9  ;;  %v1683_v0 = vsel %vm2608_vm0, %v1678_v57, %v1682_v59  ;;  %v1408_v9 = vpack.c.b16 %v1404_v3, %v1403_v2  ;;  %v1831_v25 = vpack.c.b16 %v1827_v22, %v1826_v21 }
  0xab   : > { %v1693_v7 = vunpack.c.l.b16 %v1683_v0 }
  0xb1   : > { %2166 = vmatmul.msk.bf16.gmra.mxu1 %vm671_vm10, %v1406_v54  ;;  %2187 = vmatmul.msk.bf16.gmra.mxu2 %vm671_vm10, %v2223_v55  ;;  %v1807_v54 = vsel %vm2588_vm15, %v2197_v43, %v1806_v32  ;;  %v1810_v55 = vsel %vm2588_vm15, %v1808_v44, %v1809_v45 }
  0xb2   : > { %v1824_v60 = vunpack.c.l.b16 %v1807_v54  ;;  %v1825_v61 = vunpack.c.l.b16 %v1810_v55 }
  0xb3   : > { %2192 = vmatmul.msk.bf16.gmra.mxu3 %vm671_vm10, %v1695_v56  ;;  %v1668_v56 = vrot.slane %v1667_v48, 4 }
  0xb4   : > { %v1830_v5 = vpack.c.b16 %v1825_v61, %v1824_v60 }
  0xb5   : > { %v1673_v63 = vsel %vm2608_vm0, %v1668_v56, %v1672_v33 }
  0xb6   : > { %v1692_v6 = vunpack.c.l.b16 %v1673_v63 }
  0xb8   : > { %v1697_v14 = vpack.c.b16 %v1693_v7, %v1692_v6 }
  0xba   : > { %2201 = vmatmul.msk.bf16.gmra.mxu0 %vm671_vm10, %v1829_v28 }
  0xc1   : > { %2167 = vmatmul.msk.bf16.gmra.mxu1 %vm671_vm10, %v1407_v38  ;;  %2188 = vmatmul.msk.bf16.gmra.mxu2 %vm671_vm10, %v2224_v39 }
  0xc3   : > { %2193 = vmatmul.msk.bf16.gmra.mxu3 %vm671_vm10, %v1696_v41 }
  0xca   : > { %2202 = vmatmul.msk.bf16.gmra.mxu0 %vm671_vm10, %v1830_v5 }
  0xce   : > { %v702_v13 = vpop.f32.mrf.mxu1 }
  0xcf   : > { %719 = vst.msk [vmem:[#allocation3 + $0x10] sm:$0xff] %vm671_vm10, %v702_v13 }
  0xd0   : > { %v697_v58 = vpop.f32.mrf.mxu0 }
  0xd1   : > { %2168 = vmatmul.msk.bf16.gmra.mxu1 %vm671_vm10, %v1408_v9  ;;  %2189 = vmatmul.msk.bf16.gmra.mxu2 %vm671_vm10, %v2225_v12  ;;  %717 = vst.msk [vmem:[#allocation3] sm:$0xff] %vm671_vm10, %v697_v58 }
  0xd3   : > { %2194 = vmatmul.msk.bf16.gmra.mxu3 %vm671_vm10, %v1697_v14 }
  0xd4   : > { %v707_v19 = vpop.f32.mrf.mxu2 }
  0xd5   : > { %721 = vst.msk [vmem:[#allocation3 + $0x20] sm:$0xff] %vm671_vm10, %v707_v19 }
  0xd6   : > { %v712_v20 = vpop.f32.mrf.mxu3  ;;  %v704_v23 = vpop.f32.mrf.mxu1  ;;  %v896_v42 = vld [vmem:[#allocation3 + $0x10] sm:$0xff] }
  0xd7   : > { %723 = vst.msk [vmem:[#allocation3 + $0x30] sm:$0xff] %vm671_vm10, %v712_v20 }
  0xd8   : > { %720 = vst.msk [vmem:[#allocation3 + $0x18] sm:$0xff] %vm671_vm10, %v704_v23  ;;  %v699_v24 = vpop.f32.mrf.mxu0  ;;  %v894_v28 = vld [vmem:[#allocation3] sm:$0xff] }
  0xd9   : > { %718 = vst.msk [vmem:[#allocation3 + $0x8] sm:$0xff] %vm671_vm10, %v699_v24 }
  0xda   : > { %2203 = vmatmul.msk.bf16.gmra.mxu0 %vm671_vm10, %v1831_v25 }
  0xdc   : > { %v709_v27 = vpop.f32.mrf.mxu2  ;;  %v898_v1 = vld [vmem:[#allocation3 + $0x20] sm:$0xff] }
  0xdd   : > { %722 = vst.msk [vmem:[#allocation3 + $0x28] sm:$0xff] %vm671_vm10, %v709_v27 }
  0xde   : > { %v714_v46 = vpop.f32.mrf.mxu3  ;;  %v874_v11 = vpop.f32.mrf.mxu1  ;;  %v900_v24 = vld [vmem:[#allocation3 + $0x30] sm:$0xff] }
  0xdf   : > { %724 = vst.msk [vmem:[#allocation3 + $0x38] sm:$0xff] %vm671_vm10, %v714_v46  ;;  %v902_v29 = vadd.f32 %v894_v28, %v874_v11  ;;  %v897_v53 = vld [vmem:[#allocation3 + $0x18] sm:$0xff] }
  0xe0   : > { %v895_v32 = vld [vmem:[#allocation3 + $0x8] sm:$0xff] }
  0xe1   : > { %910 = vst.msk [vmem:[#allocation3] sm:$0xff] %vm671_vm10, %v902_v29 }
  0xe4   : > { %v1011_v31 = vpop.f32.mrf.mxu2  ;;  %v899_v14 = vld [vmem:[#allocation3 + $0x28] sm:$0xff] }
  0xe6   : > { %v1109_v33 = vpop.f32.mrf.mxu3  ;;  %v876_v34 = vpop.f32.mrf.mxu1 }
  0xe7   : > { %v903_v36 = vadd.f32 %v895_v32, %v876_v34  ;;  %v1299_v38 = vpop.f32.mrf.mxu0 }
  0xe8   : > { %v1031_v37 = vld [vmem:[#allocation3] sm:$0xff] }
  0xe9   : > { %v1039_v35 = vadd.f32 %v1031_v37, %v1011_v31  ;;  %911 = vst.msk [vmem:[#allocation3 + $0x8] sm:$0xff] %vm671_vm10, %v903_v36  ;;  %v901_v37 = vld [vmem:[#allocation3 + $0x38] sm:$0xff] }
  0xeb   : > { %1047 = vst.msk [vmem:[#allocation3] sm:$0xff] %vm671_vm10, %v1039_v35 }
  0xec   : > { %v1013_v39 = vpop.f32.mrf.mxu2 }
  0xee   : > { %v1111_v41 = vpop.f32.mrf.mxu3  ;;  %v879_v40 = vpop.f32.mrf.mxu1 }
  0xef   : > { %v904_v43 = vadd.f32 %v896_v42, %v879_v40  ;;  %v1301_v48 = vpop.f32.mrf.mxu0 }
  0xf0   : > { %v1032_v44 = vld [vmem:[#allocation3 + $0x8] sm:$0xff] }
  0xf1   : > { %v1040_v45 = vadd.f32 %v1032_v44, %v1013_v39  ;;  %912 = vst.msk [vmem:[#allocation3 + $0x10] sm:$0xff] %vm671_vm10, %v904_v43 }
  0xf2   : > { %v1129_v47 = vld [vmem:[#allocation3] sm:$0xff] }
  0xf3   : > { %v1137_v49 = vadd.f32 %v1129_v47, %v1109_v33  ;;  %1048 = vst.msk [vmem:[#allocation3 + $0x8] sm:$0xff] %vm671_vm10, %v1040_v45 }
  0xf4   : > { %v1016_v50 = vpop.f32.mrf.mxu2 }
  0xf5   : > { %1145 = vst.msk [vmem:[#allocation3] sm:$0xff] %vm671_vm10, %v1137_v49 }
  0xf6   : > { %v1114_v51 = vpop.f32.mrf.mxu3  ;;  %v881_v52 = vpop.f32.mrf.mxu1 }
  0xf7   : > { %v905_v54 = vadd.f32 %v897_v53, %v881_v52  ;;  %v1304_v59 = vpop.f32.mrf.mxu0 }
  0xf8   : > { %v1033_v55 = vld [vmem:[#allocation3 + $0x10] sm:$0xff] }
  0xf9   : > { %v1041_v56 = vadd.f32 %v1033_v55, %v1016_v50  ;;  %913 = vst.msk [vmem:[#allocation3 + $0x18] sm:$0xff] %vm671_vm10, %v905_v54 }
  0xfa   : > { %v1130_v57 = vld [vmem:[#allocation3 + $0x8] sm:$0xff] }
  0xfb   : > { %v1138_v60 = vadd.f32 %v1130_v57, %v1111_v41  ;;  %1049 = vst.msk [vmem:[#allocation3 + $0x10] sm:$0xff] %vm671_vm10, %v1041_v56 }
  0xfc   : > { %v1319_v61 = vld [vmem:[#allocation3] sm:$0xff]  ;;  %v1018_v30 = vpop.f32.mrf.mxu2 }
  0xfd   : > { %1146 = vst.msk [vmem:[#allocation3 + $0x8] sm:$0xff] %vm671_vm10, %v1138_v60  ;;  %v1327_v62 = vadd.f32 %v1319_v61, %v1299_v38 }
  0xfe   : > { %v1116_v63 = vpop.f32.mrf.mxu3  ;;  %v884_v0 = vpop.f32.mrf.mxu1 }
  0xff   : > { %1335 = vst.msk [vmem:[#allocation3] sm:$0xff] %vm671_vm10, %v1327_v62  ;;  %v906_v2 = vadd.f32 %v898_v1, %v884_v0  ;;  %v1306_v7 = vpop.f32.mrf.mxu0 }
 0x100   : > { %v1034_v3 = vld [vmem:[#allocation3 + $0x18] sm:$0xff] }
 0x101   : > { %v1042_v5 = vadd.f32 %v1034_v3, %v1018_v30  ;;  %914 = vst.msk [vmem:[#allocation3 + $0x20] sm:$0xff] %vm671_vm10, %v906_v2 }
 0x102   : > { %v1131_v6 = vld [vmem:[#allocation3 + $0x10] sm:$0xff] }
 0x103   : > { %v1139_v8 = vadd.f32 %v1131_v6, %v1114_v51  ;;  %1050 = vst.msk [vmem:[#allocation3 + $0x18] sm:$0xff] %vm671_vm10, %v1042_v5 }
 0x104   : > { %v1320_v4 = vld [vmem:[#allocation3 + $0x8] sm:$0xff]  ;;  %v1021_v10 = vpop.f32.mrf.mxu2 }
 0x105   : > { %1147 = vst.msk [vmem:[#allocation3 + $0x10] sm:$0xff] %vm671_vm10, %v1139_v8  ;;  %v1328_v9 = vadd.f32 %v1320_v4, %v1301_v48 }
 0x106   : > { %v1119_v12 = vpop.f32.mrf.mxu3  ;;  %v886_v13 = vpop.f32.mrf.mxu1  ;;  %v1453_v49 = vld [vmem:[#allocation3] sm:$0xff] }
 0x107   : > { %1336 = vst.msk [vmem:[#allocation3 + $0x8] sm:$0xff] %vm671_vm10, %v1328_v9  ;;  %v907_v15 = vadd.f32 %v899_v14, %v886_v13  ;;  %v1309_v17 = vpop.f32.mrf.mxu0 }
 0x108   : > { %v1035_v26 = vld [vmem:[#allocation3 + $0x20] sm:$0xff] }
 0x109   : > { %v1043_v16 = vadd.f32 %v1035_v26, %v1021_v10  ;;  %915 = vst.msk [vmem:[#allocation3 + $0x28] sm:$0xff] %vm671_vm10, %v907_v15 }
 0x10a   : > { %v1132_v58 = vld [vmem:[#allocation3 + $0x18] sm:$0xff] }
 0x10b   : > { %v1140_v18 = vadd.f32 %v1132_v58, %v1116_v63  ;;  %1051 = vst.msk [vmem:[#allocation3 + $0x20] sm:$0xff] %vm671_vm10, %v1043_v16 }
 0x10c   : > { %v1321_v19 = vld [vmem:[#allocation3 + $0x10] sm:$0xff]  ;;  %v1023_v20 = vpop.f32.mrf.mxu2 }
 0x10d   : > { %1148 = vst.msk [vmem:[#allocation3 + $0x18] sm:$0xff] %vm671_vm10, %v1140_v18  ;;  %v1329_v21 = vadd.f32 %v1321_v19, %v1304_v59 }
 0x10e   : > { %v1121_v22 = vpop.f32.mrf.mxu3  ;;  %v889_v23 = vpop.f32.mrf.mxu1  ;;  %v1454_v30 = vld [vmem:[#allocation3 + $0x8] sm:$0xff] }
 0x10f   : > { %1337 = vst.msk [vmem:[#allocation3 + $0x10] sm:$0xff] %vm671_vm10, %v1329_v21  ;;  %v908_v25 = vadd.f32 %v900_v24, %v889_v23  ;;  %v1311_v11 = vpop.f32.mrf.mxu0 }
 0x110   : > { %v1036_v27 = vld [vmem:[#allocation3 + $0x28] sm:$0xff] }
 0x111   : > { %v1044_v28 = vadd.f32 %v1036_v27, %v1023_v20  ;;  %916 = vst.msk [vmem:[#allocation3 + $0x30] sm:$0xff] %vm671_vm10, %v908_v25 }
 0x112   : > { %v1133_v46 = vld [vmem:[#allocation3 + $0x20] sm:$0xff] }
 0x113   : > { %v1141_v29 = vadd.f32 %v1133_v46, %v1119_v12  ;;  %1052 = vst.msk [vmem:[#allocation3 + $0x28] sm:$0xff] %vm671_vm10, %v1044_v28 }
 0x114   : > { %v1322_v31 = vld [vmem:[#allocation3 + $0x18] sm:$0xff]  ;;  %v1026_v32 = vpop.f32.mrf.mxu2 }
 0x115   : > { %1149 = vst.msk [vmem:[#allocation3 + $0x20] sm:$0xff] %vm671_vm10, %v1141_v29  ;;  %v1330_v33 = vadd.f32 %v1322_v31, %v1306_v7 }
 0x116   : > { %v1124_v34 = vpop.f32.mrf.mxu3  ;;  %v891_v36 = vpop.f32.mrf.mxu1  ;;  %v1455_v8 = vld [vmem:[#allocation3 + $0x10] sm:$0xff] }
 0x117   : > { %1338 = vst.msk [vmem:[#allocation3 + $0x18] sm:$0xff] %vm671_vm10, %v1330_v33  ;;  %v909_v35 = vadd.f32 %v901_v37, %v891_v36  ;;  %v1314_v40 = vpop.f32.mrf.mxu0  ;;  %v2800_v37 = vld [vmem:[%s2866_s4] ss:$0 sm:$0xff] }
 0x118   : > { %v1037_v38 = vld [vmem:[#allocation3 + $0x30] sm:$0xff] }
 0x119   : > { %v1045_v39 = vadd.f32 %v1037_v38, %v1026_v32  ;;  %917 = vst.msk [vmem:[#allocation3 + $0x38] sm:$0xff] %vm671_vm10, %v909_v35 }
 0x11a   : > { %v1134_v41 = vld [vmem:[#allocation3 + $0x28] sm:$0xff] }
 0x11b   : > { %v1142_v42 = vadd.f32 %v1134_v41, %v1121_v22  ;;  %1053 = vst.msk [vmem:[#allocation3 + $0x30] sm:$0xff] %vm671_vm10, %v1045_v39 }
 0x11c   : > { %v1323_v43 = vld [vmem:[#allocation3 + $0x20] sm:$0xff]  ;;  %v1028_v44 = vpop.f32.mrf.mxu2 }
 0x11d   : > { %1150 = vst.msk [vmem:[#allocation3 + $0x28] sm:$0xff] %vm671_vm10, %v1142_v42  ;;  %v1331_v45 = vadd.f32 %v1323_v43, %v1309_v17 }
 0x11e   : > { %v1126_v47 = vpop.f32.mrf.mxu3  ;;  %v1433_v48 = vpop.f32.mrf.mxu1  ;;  %v1456_v18 = vld [vmem:[#allocation3 + $0x18] sm:$0xff] }
 0x11f   : > { %1339 = vst.msk [vmem:[#allocation3 + $0x20] sm:$0xff] %vm671_vm10, %v1331_v45  ;;  %v1461_v50 = vadd.f32 %v1453_v49, %v1433_v48  ;;  %v1316_v57 = vpop.f32.mrf.mxu0 }
 0x120   : > { %v1038_v51 = vld [vmem:[#allocation3 + $0x38] sm:$0xff] }
 0x121   : > { %v1046_v52 = vadd.f32 %v1038_v51, %v1028_v44  ;;  %1469 = vst.msk [vmem:[#allocation3] sm:$0xff] %vm671_vm10, %v1461_v50 }
 0x122   : > { %v1135_v53 = vld [vmem:[#allocation3 + $0x30] sm:$0xff] }
 0x123   : > { %v1143_v54 = vadd.f32 %v1135_v53, %v1124_v34  ;;  %1054 = vst.msk [vmem:[#allocation3 + $0x38] sm:$0xff] %vm671_vm10, %v1046_v52 }
 0x124   : > { %v1324_v55 = vld [vmem:[#allocation3 + $0x28] sm:$0xff]  ;;  %v1532_v56 = vpop.f32.mrf.mxu2 }
 0x125   : > { %1151 = vst.msk [vmem:[#allocation3 + $0x30] sm:$0xff] %vm671_vm10, %v1143_v54  ;;  %v1332_v59 = vadd.f32 %v1324_v55, %v1311_v11 }
 0x126   : > { %v1722_v60 = vpop.f32.mrf.mxu3  ;;  %v1435_v61 = vpop.f32.mrf.mxu1  ;;  %v1457_v29 = vld [vmem:[#allocation3 + $0x20] sm:$0xff] }
 0x127   : > { %1340 = vst.msk [vmem:[#allocation3 + $0x28] sm:$0xff] %vm671_vm10, %v1332_v59  ;;  %v1462_v62 = vadd.f32 %v1454_v30, %v1435_v61  ;;  %v1856_v4 = vpop.f32.mrf.mxu0 }
 0x128   : > { %v1552_v63 = vld [vmem:[#allocation3] sm:$0xff] }
 0x129   : > { %v1560_v0 = vadd.f32 %v1552_v63, %v1532_v56  ;;  %1470 = vst.msk [vmem:[#allocation3 + $0x8] sm:$0xff] %vm671_vm10, %v1462_v62 }
 0x12a   : > { %v1136_v1 = vld [vmem:[#allocation3 + $0x38] sm:$0xff] }
 0x12b   : > { %v1144_v2 = vadd.f32 %v1136_v1, %v1126_v47  ;;  %1568 = vst.msk [vmem:[#allocation3] sm:$0xff] %vm671_vm10, %v1560_v0 }
 0x12c   : > { %v1325_v3 = vld [vmem:[#allocation3 + $0x30] sm:$0xff]  ;;  %v1534_v5 = vpop.f32.mrf.mxu2 }
 0x12d   : > { %1152 = vst.msk [vmem:[#allocation3 + $0x38] sm:$0xff] %vm671_vm10, %v1144_v2  ;;  %v1333_v6 = vadd.f32 %v1325_v3, %v1314_v40 }
 0x12e   : > { %v1438_v7 = vpop.f32.mrf.mxu1  ;;  %v1724_v9 = vpop.f32.mrf.mxu3  ;;  %v1458_v44 = vld [vmem:[#allocation3 + $0x28] sm:$0xff] }
 0x12f   : > { %1341 = vst.msk [vmem:[#allocation3 + $0x30] sm:$0xff] %vm671_vm10, %v1333_v6  ;;  %v1463_v10 = vadd.f32 %v1455_v8, %v1438_v7  ;;  %v1858_v21 = vpop.f32.mrf.mxu0 }
 0x130   : > { %v1553_v12 = vld [vmem:[#allocation3 + $0x8] sm:$0xff] }
 0x131   : > { %v1561_v13 = vadd.f32 %v1553_v12, %v1534_v5  ;;  %1471 = vst.msk [vmem:[#allocation3 + $0x10] sm:$0xff] %vm671_vm10, %v1463_v10 }
 0x132   : > { %v1742_v14 = vld [vmem:[#allocation3] sm:$0xff] }
 0x133   : > { %v1750_v15 = vadd.f32 %v1742_v14, %v1722_v60  ;;  %1569 = vst.msk [vmem:[#allocation3 + $0x8] sm:$0xff] %vm671_vm10, %v1561_v13 }
 0x134   : > { %v1326_v26 = vld [vmem:[#allocation3 + $0x38] sm:$0xff]  ;;  %v1537_v16 = vpop.f32.mrf.mxu2 }
 0x135   : > { %1758 = vst.msk [vmem:[#allocation3] sm:$0xff] %vm671_vm10, %v1750_v15  ;;  %v1334_v58 = vadd.f32 %v1326_v26, %v1316_v57 }
 0x136   : > { %v1440_v17 = vpop.f32.mrf.mxu1  ;;  %v1727_v23 = vpop.f32.mrf.mxu3  ;;  %v1459_v60 = vld [vmem:[#allocation3 + $0x30] sm:$0xff] }
 0x137   : > { %1342 = vst.msk [vmem:[#allocation3 + $0x38] sm:$0xff] %vm671_vm10, %v1334_v58  ;;  %v1464_v19 = vadd.f32 %v1456_v18, %v1440_v17  ;;  %v1861_v36 = vpop.f32.mrf.mxu0 }
 0x138   : > { %v1554_v20 = vld [vmem:[#allocation3 + $0x10] sm:$0xff] }
 0x139   : > { %v1562_v22 = vadd.f32 %v1554_v20, %v1537_v16  ;;  %1472 = vst.msk [vmem:[#allocation3 + $0x18] sm:$0xff] %vm671_vm10, %v1464_v19 }
 0x13a   : > { %v1743_v24 = vld [vmem:[#allocation3 + $0x8] sm:$0xff] }
 0x13b   : > { %v1751_v25 = vadd.f32 %v1743_v24, %v1724_v9  ;;  %1570 = vst.msk [vmem:[#allocation3 + $0x10] sm:$0xff] %vm671_vm10, %v1562_v22 }
 0x13c   : > { %v1876_v27 = vld [vmem:[#allocation3] sm:$0xff]  ;;  %v1539_v28 = vpop.f32.mrf.mxu2 }
 0x13d   : > { %1759 = vst.msk [vmem:[#allocation3 + $0x8] sm:$0xff] %vm671_vm10, %v1751_v25  ;;  %v1884_v46 = vadd.f32 %v1876_v27, %v1856_v4 }
 0x13e   : > { %v1443_v11 = vpop.f32.mrf.mxu1  ;;  %v1729_v38 = vpop.f32.mrf.mxu3  ;;  %v1460_v8 = vld [vmem:[#allocation3 + $0x38] sm:$0xff] }
 0x13f   : > { %1892 = vst.msk [vmem:[#allocation3] sm:$0xff] %vm671_vm10, %v1884_v46  ;;  %v1465_v31 = vadd.f32 %v1457_v29, %v1443_v11  ;;  %v1863_v53 = vpop.f32.mrf.mxu0 }
 0x140   : > { %v1555_v32 = vld [vmem:[#allocation3 + $0x18] sm:$0xff] }
 0x141   : > { %v1563_v33 = vadd.f32 %v1555_v32, %v1539_v28  ;;  %1473 = vst.msk [vmem:[#allocation3 + $0x20] sm:$0xff] %vm671_vm10, %v1465_v31 }
 0x142   : > { %v1744_v34 = vld [vmem:[#allocation3 + $0x10] sm:$0xff] }
 0x143   : > { %v1752_v35 = vadd.f32 %v1744_v34, %v1727_v23  ;;  %1571 = vst.msk [vmem:[#allocation3 + $0x18] sm:$0xff] %vm671_vm10, %v1563_v33 }
 0x144   : > { %v1877_v39 = vld [vmem:[#allocation3 + $0x8] sm:$0xff]  ;;  %v1542_v41 = vpop.f32.mrf.mxu2 }
 0x145   : > { %1760 = vst.msk [vmem:[#allocation3 + $0x10] sm:$0xff] %vm671_vm10, %v1752_v35  ;;  %v1885_v40 = vadd.f32 %v1877_v39, %v1858_v21 }
 0x146   : > { %v1900_v42 = vld [vmem:[#allocation3] sm:$0xff]  ;;  %v1445_v43 = vpop.f32.mrf.mxu1  ;;  %v1732_v55 = vpop.f32.mrf.mxu3 }
 0x147   : > { %v1912_v45 = vadd.f32 %v2800_v37, %v1900_v42  ;;  %1893 = vst.msk [vmem:[#allocation3 + $0x8] sm:$0xff] %vm671_vm10, %v1885_v40  ;;  %v1466_v47 = vadd.f32 %v1458_v44, %v1445_v43  ;;  %v1866_v6 = vpop.f32.mrf.mxu0 }
 0x148   : > { %v1556_v48 = vld [vmem:[#allocation3 + $0x20] sm:$0xff] }
 0x149   : > { %1920 = vst.msk [vmem:[%s2414_s19] sm:$0xff] %vm671_vm10, %v1912_v45  ;;  %v1564_v49 = vadd.f32 %v1556_v48, %v1542_v41 }
 0x14a   : > { %v1745_v50 = vld [vmem:[#allocation3 + $0x18] sm:$0xff]  ;;  %1474 = vst.msk [vmem:[#allocation3 + $0x28] sm:$0xff] %vm671_vm10, %v1466_v47 }
 0x14b   : > { %v1753_v51 = vadd.f32 %v1745_v50, %v1729_v38  ;;  %1572 = vst.msk [vmem:[#allocation3 + $0x20] sm:$0xff] %vm671_vm10, %v1564_v49 }
 0x14c   : > { %v1878_v52 = vld [vmem:[#allocation3 + $0x10] sm:$0xff]  ;;  %v1544_v56 = vpop.f32.mrf.mxu2 }
 0x14d   : > { %1761 = vst.msk [vmem:[#allocation3 + $0x18] sm:$0xff] %vm671_vm10, %v1753_v51  ;;  %v1886_v54 = vadd.f32 %v1878_v52, %v1861_v36 }
 0x14e   : > { %v1901_v57 = vld [vmem:[#allocation3 + $0x8] sm:$0xff]  ;;  %v1448_v59 = vpop.f32.mrf.mxu1  ;;  %v1734_v10 = vpop.f32.mrf.mxu3 }
 0x14f   : > { %v1913_v61 = vadd.f32 %v2800_v37, %v1901_v57  ;;  %1894 = vst.msk [vmem:[#allocation3 + $0x10] sm:$0xff] %vm671_vm10, %v1886_v54  ;;  %v1467_v30 = vadd.f32 %v1459_v60, %v1448_v59  ;;  %v1868_v19 = vpop.f32.mrf.mxu0 }
 0x151   : > { %1921 = vst.msk [vmem:[%s2414_s19 + $0x8] sm:$0xff] %vm671_vm10, %v1913_v61  ;;  %v1557_v62 = vld [vmem:[#allocation3 + $0x28] sm:$0xff] }
 0x152   : > { %v1746_v63 = vld [vmem:[#allocation3 + $0x20] sm:$0xff]  ;;  %v1565_v0 = vadd.f32 %v1557_v62, %v1544_v56  ;;  %1475 = vst.msk [vmem:[#allocation3 + $0x30] sm:$0xff] %vm671_vm10, %v1467_v30 }
 0x153   : > { %v1754_v1 = vadd.f32 %v1746_v63, %v1732_v55 }
 0x154   : > { %1573 = vst.msk [vmem:[#allocation3 + $0x28] sm:$0xff] %vm671_vm10, %v1565_v0  ;;  %v1879_v2 = vld [vmem:[#allocation3 + $0x18] sm:$0xff]  ;;  %v1547_v9 = vpop.f32.mrf.mxu2 }
 0x155   : > { %1762 = vst.msk [vmem:[#allocation3 + $0x20] sm:$0xff] %vm671_vm10, %v1754_v1  ;;  %v1887_v3 = vadd.f32 %v1879_v2, %v1863_v53 }
 0x156   : > { %v1902_v5 = vld [vmem:[#allocation3 + $0x10] sm:$0xff]  ;;  %v1450_v7 = vpop.f32.mrf.mxu1  ;;  %v1737_v20 = vpop.f32.mrf.mxu3 }
 0x157   : > { %v1914_v4 = vadd.f32 %v2800_v37, %v1902_v5  ;;  %1895 = vst.msk [vmem:[#allocation3 + $0x18] sm:$0xff] %vm671_vm10, %v1887_v3  ;;  %v1468_v12 = vadd.f32 %v1460_v8, %v1450_v7  ;;  %v1871_v32 = vpop.f32.mrf.mxu0 }
 0x159   : > { %1922 = vst.msk [vmem:[%s2414_s19 + $0x10] sm:$0xff] %vm671_vm10, %v1914_v4  ;;  %v1558_v13 = vld [vmem:[#allocation3 + $0x30] sm:$0xff] }
 0x15a   : > { %v1566_v14 = vadd.f32 %v1558_v13, %v1547_v9  ;;  %1476 = vst.msk [vmem:[#allocation3 + $0x38] sm:$0xff] %vm671_vm10, %v1468_v12 }
 0x15b   : > { %v1747_v15 = vld [vmem:[#allocation3 + $0x28] sm:$0xff] }
 0x15c   : > { %v1755_v26 = vadd.f32 %v1747_v15, %v1734_v10  ;;  %1574 = vst.msk [vmem:[#allocation3 + $0x30] sm:$0xff] %vm671_vm10, %v1566_v14  ;;  %v1880_v16 = vld [vmem:[#allocation3 + $0x20] sm:$0xff]  ;;  %v1549_v21 = vpop.f32.mrf.mxu2 }
 0x15d   : > { %v1888_v58 = vadd.f32 %v1880_v16, %v1866_v6 }
 0x15e   : > { %v1903_v17 = vld [vmem:[#allocation3 + $0x18] sm:$0xff]  ;;  %1763 = vst.msk [vmem:[#allocation3 + $0x28] sm:$0xff] %vm671_vm10, %v1755_v26  ;;  %v1739_v29 = vpop.f32.mrf.mxu3 }
 0x15f   : > { %v1915_v18 = vadd.f32 %v2800_v37, %v1903_v17  ;;  %1896 = vst.msk [vmem:[#allocation3 + $0x20] sm:$0xff] %vm671_vm10, %v1888_v58  ;;  %v1873_v39 = vpop.f32.mrf.mxu0 }
 0x161   : > { %1923 = vst.msk [vmem:[%s2414_s19 + $0x18] sm:$0xff] %vm671_vm10, %v1915_v18  ;;  %v1559_v22 = vld [vmem:[#allocation3 + $0x38] sm:$0xff] }
 0x162   : > { %v1567_v23 = vadd.f32 %v1559_v22, %v1549_v21 }
 0x163   : > { %v1748_v24 = vld [vmem:[#allocation3 + $0x30] sm:$0xff] }
 0x164   : > { %v1756_v25 = vadd.f32 %v1748_v24, %v1737_v20  ;;  %1575 = vst.msk [vmem:[#allocation3 + $0x38] sm:$0xff] %vm671_vm10, %v1567_v23 }
 0x165   : > { %v1881_v27 = vld [vmem:[#allocation3 + $0x28] sm:$0xff] }
 0x166   : > { %v1904_v28 = vld [vmem:[#allocation3 + $0x20] sm:$0xff]  ;;  %1764 = vst.msk [vmem:[#allocation3 + $0x30] sm:$0xff] %vm671_vm10, %v1756_v25  ;;  %v1889_v46 = vadd.f32 %v1881_v27, %v1868_v19 }
 0x167   : > { %v1916_v11 = vadd.f32 %v2800_v37, %v1904_v28 }
 0x168   : > { %1897 = vst.msk [vmem:[#allocation3 + $0x28] sm:$0xff] %vm671_vm10, %v1889_v46 }
 0x169   : > { %1924 = vst.msk [vmem:[%s2414_s19 + $0x20] sm:$0xff] %vm671_vm10, %v1916_v11 }
 0x16b   : > { %v1749_v31 = vld [vmem:[#allocation3 + $0x38] sm:$0xff] }
 0x16c   : > { %v1757_v33 = vadd.f32 %v1749_v31, %v1739_v29 }
 0x16d   : > { %v1882_v34 = vld [vmem:[#allocation3 + $0x30] sm:$0xff] }
 0x16e   : > { %1765 = vst.msk [vmem:[#allocation3 + $0x38] sm:$0xff] %vm671_vm10, %v1757_v33  ;;  %v1890_v36 = vadd.f32 %v1882_v34, %v1871_v32 }
 0x16f   : > { %v1905_v35 = vld [vmem:[#allocation3 + $0x28] sm:$0xff] }
 0x170   : > { %v1917_v38 = vadd.f32 %v2800_v37, %v1905_v35  ;;  %1898 = vst.msk [vmem:[#allocation3 + $0x30] sm:$0xff] %vm671_vm10, %v1890_v36 }
 0x172   : > { %1925 = vst.msk [vmem:[%s2414_s19 + $0x28] sm:$0xff] %vm671_vm10, %v1917_v38 }
 0x175   : > { %v1883_v41 = vld [vmem:[#allocation3 + $0x38] sm:$0xff] }
 0x176   : > { %v1891_v40 = vadd.f32 %v1883_v41, %v1873_v39 }
 0x177   : > { %v1906_v42 = vld [vmem:[#allocation3 + $0x30] sm:$0xff] }
 0x178   : > { %v1918_v43 = vadd.f32 %v2800_v37, %v1906_v42  ;;  %1899 = vst.msk [vmem:[#allocation3 + $0x38] sm:$0xff] %vm671_vm10, %v1891_v40 }
 0x17a   : > { %1926 = vst.msk [vmem:[%s2414_s19 + $0x30] sm:$0xff] %vm671_vm10, %v1918_v43 }
 0x17f   : > { %v1907_v44 = vld [vmem:[#allocation3 + $0x38] sm:$0xff] }
 0x180   : > { %v1919_v45 = vadd.f32 %v2800_v37, %v1907_v44 }
 0x182   : > { %1927 = vst.msk [vmem:[%s2414_s19 + $0x38] sm:$0xff] %vm671_vm10, %v1919_v45 }
 0x183 PF: > { %s15_s22 = sadd.s32 1, %s2310_s22   ;;  %s2881_s18 = smov %s2302_s20 }
 0x184   : > { %p12_p13 = scmp.ge.s32.totalorder %s15_s22, 10   ;;  %s2882_s19 = smov %s2306_s21 }
 0x185   : > { %s2883_s20 = smov %s2886_s23  ;;  %s2884_s21 = smov %s2890_s24 }
 0x186   :  { %14 = sbr.rel (!%p12_p13) target bundleno = 3 (0x3), region = 95 }

</bundles_post_ra>
